<compile_context>
chip_gen: v7x
topology: tpu7x:2x2x1
jax: 0.10.0
libtpu: 0.0.40
codegen_flags: <defaults>
</compile_context>

<pallas_src>
import functools

import jax
import jax.numpy as jnp
import numpy as np
from jax.experimental import pallas as pl
from jax.experimental.pallas import tpu as pltpu


# --------------------------------------------------------------------------
# Kernel
# --------------------------------------------------------------------------
def _make_kernel(n_layers, seq, bpad, hid_dim):
    H = hid_dim

    def kernel(*refs):
        # refs layout:
        #   x_ref                    (seq*bpad, in_dim)
        #   per layer (4 refs):      wi (in_l, 3H), wh (H, 3H),
        #                            bi (1, 3H),    bh (1, 3H)
        #   heads (4 refs):          w1 (H, n_pose+n_class), b1 (1, ...)
        #                            w2 (n_pose+n_class, n_class+n_pose), b2
        #   out_ref                  (seq*bpad, n_class+n_pose+H)
        #   scratch: gx_ref (seq*bpad, 3H), hseq_ref (seq*bpad, H)
        idx = 0
        x_ref = refs[idx]; idx += 1
        layer_refs = []
        for _ in range(n_layers):
            layer_refs.append(refs[idx:idx + 4]); idx += 4
        w1, b1, w2, b2 = refs[idx:idx + 4]; idx += 4
        out_ref = refs[idx]; idx += 1
        gx_ref, hseq_ref = refs[idx:idx + 2]

        for l in range(n_layers):
            wi, wh, bi, bh = layer_refs[l]
            layer_in = x_ref[...] if l == 0 else hseq_ref[...]

            # Input-side gates for ALL time steps in one big matmul (hoisted
            # out of the recurrence).  Columns: [r | z | n]; input biases
            # folded in.
            gx_ref[...] = (
                jnp.dot(layer_in, wi[...], preferred_element_type=jnp.float32)
                + bi[...])

            wh_v = wh[...]   # hoisted loads (stay in vregs across the loop)
            bh_v = bh[...]

            def step(t, h, _wh=wh_v, _bh=bh_v):
                start = pl.multiple_of(t * bpad, bpad)
                gx = gx_ref[pl.ds(start, bpad), :]              # (bpad, 3H)
                gh = jnp.dot(h, _wh,
                             preferred_element_type=jnp.float32) + _bh
                r = jax.nn.sigmoid(gx[:, 0:H] + gh[:, 0:H])
                z = jax.nn.sigmoid(gx[:, H:2 * H] + gh[:, H:2 * H])
                n = jnp.tanh(gx[:, 2 * H:3 * H] + r * gh[:, 2 * H:3 * H])
                h_new = n + z * (h - n)                 # == (1-z)*n + z*h
                hseq_ref[pl.ds(start, bpad), :] = h_new
                return h_new

            h0 = jnp.zeros((bpad, H), jnp.float32)      # gru(x, None) -> 0
            jax.lax.fori_loop(0, seq, step, h0, unroll=True)

        # Heads, once over the whole (top-layer) hidden sequence.
        hid = hseq_ref[...]                             # (seq*bpad, H)
        s1 = jnp.dot(hid, w1[...],
                     preferred_element_type=jnp.float32) + b1[...]  # [c1|p1]
        cp = jnp.dot(s1, w2[...],
                     preferred_element_type=jnp.float32) + b2[...]  # [cls|pose]
        out_ref[...] = jnp.concatenate([cp, hid], axis=-1)

    return kernel


# --------------------------------------------------------------------------
# Parameter packing (PyTorch-style per-gate params -> fused kernel params)
# --------------------------------------------------------------------------
def _pack_params(layer_params, head_params):
    packed_layers = []
    for lp in layer_params:
        (wir, wiz, win, whr, whz, whn,
         b_ir, b_iz, b_in, b_hr, b_hz, b_hn) = lp
        wi = jnp.concatenate([wir, wiz, win], axis=1)        # (in, 3H)
        wh = jnp.concatenate([whr, whz, whn], axis=1)        # (H, 3H)
        bi = jnp.concatenate([b_ir, b_iz, b_in], axis=1)     # (1, 3H)
        bh = jnp.concatenate([b_hr, b_hz, b_hn], axis=1)     # (1, 3H)
        packed_layers.append((wi, wh, bi, bh))

    w1c, b1c, w2c, b2c, w1p, b1p, w2p, b2p = head_params
    n_class = w2c.shape[1]
    n_pose = w2p.shape[1]
    # stage 1: hid @ [w1c | w1p]  ->  [c1 | p1]
    w1 = jnp.concatenate([w1c, w1p], axis=1)                 # (H, n_pose+n_class)
    b1 = jnp.concatenate([b1c, b1p], axis=1)
    # stage 2: block-diagonal -> one matmul yields [class | pose]
    w2 = jnp.block(
        [[w2c, jnp.zeros((w2c.shape[0], n_pose), w2c.dtype)],
         [jnp.zeros((w2p.shape[0], n_class), w2p.dtype), w2p]])
    b2 = jnp.concatenate([b2c, b2p], axis=1)
    return packed_layers, (w1, b1, w2, b2)


# --------------------------------------------------------------------------
# Wrapper
# --------------------------------------------------------------------------
def decoder0_forward(x, layer_params, head_params, hid_dim, n_class, n_pose):
    seq, batch, input_size = x.shape
    n_layers = len(layer_params)
    H = hid_dim
    bpad = ((batch + 7) // 8) * 8
    total = n_class + n_pose + H

    # zero-pad batch to a full sublane group and flatten (time, batch) rows
    x_p = jnp.zeros((seq, bpad, input_size), jnp.float32)
    x_p = x_p.at[:, :batch, :].set(x.astype(jnp.float32))
    x_flat = x_p.reshape(seq * bpad, input_size)

    packed_layers, packed_heads = _pack_params(layer_params, head_params)

    kernel = _make_kernel(n_layers, seq, bpad, H)

    def full_spec(arr):
        return pl.BlockSpec(arr.shape, lambda i: (0, 0))     # all params are 2D

    flat_args = [x_flat]
    in_specs = [full_spec(x_flat)]
    for lp in packed_layers:
        for w in lp:
            flat_args.append(w)
            in_specs.append(full_spec(w))
    for w in packed_heads:
        flat_args.append(w)
        in_specs.append(full_spec(w))

    out_specs = pl.BlockSpec((seq * bpad, total), lambda i: (0, 0))
    out_shape = jax.ShapeDtypeStruct((seq * bpad, total), jnp.float32)

    grid_spec = pltpu.PrefetchScalarGridSpec(
        num_scalar_prefetch=0,
        grid=(1,),                         # whole sequence in one invocation
        in_specs=in_specs,
        out_specs=out_specs,
        scratch_shapes=[
            pltpu.VMEM((seq * bpad, 3 * H), jnp.float32),   # hoisted gates
            pltpu.VMEM((seq * bpad, H), jnp.float32),       # hidden sequence
        ],
    )

    out = pl.pallas_call(
        kernel,
        out_shape=out_shape,
        grid_spec=grid_spec,
        compiler_params=pltpu.CompilerParams(
            dimension_semantics=("arbitrary",)),
    )(*flat_args)

    out = out.reshape(seq, bpad, total)[:, :batch, :]
    class_out = out[..., :n_class]
    pose_out = out[..., n_class:n_class + n_pose]
    hidden = out[..., n_class + n_pose:]
    return class_out, pose_out, hidden


# --------------------------------------------------------------------------
# Pure-JAX reference (PyTorch GRU + head semantics, unfused params)
# --------------------------------------------------------------------------
def decoder0_ref(x, layer_params, head_params, hid_dim):
    seq, batch, _ = x.shape
    n_layers = len(layer_params)
    h = [jnp.zeros((batch, hid_dim), jnp.float32) for _ in range(n_layers)]
    hid_outs = []
    for t in range(seq):
        inp = x[t]
        for l in range(n_layers):
            (wir, wiz, win, whr, whz, whn,
             b_ir, b_iz, b_in, b_hr, b_hz, b_hn) = layer_params[l]
            r = jax.nn.sigmoid(inp @ wir + b_ir + h[l] @ whr + b_hr)
            z = jax.nn.sigmoid(inp @ wiz + b_iz + h[l] @ whz + b_hz)
            n = jnp.tanh(inp @ win + b_in + r * (h[l] @ whn + b_hn))
            h[l] = (1.0 - z) * n + z * h[l]
            inp = h[l]
        hid_outs.append(inp)
    hidden = jnp.stack(hid_outs, axis=0)
    w1c, b1c, w2c, b2c, w1p, b1p, w2p, b2p = head_params
    class_out = (hidden @ w1c + b1c) @ w2c + b2c
    pose_out = (hidden @ w1p + b1p) @ w2p + b2p
    return class_out, pose_out, hidden


# --------------------------------------------------------------------------
# Deterministic PyTorch-style initialization U(-1/sqrt(H), 1/sqrt(H))
# --------------------------------------------------------------------------
def init_params(key, input_size, hid_dim, n_class, n_pose, n_layers):
    H = hid_dim
    scale = 1.0 / np.sqrt(H)

    def u(key, shape):
        return jax.random.uniform(key, shape, jnp.float32, -scale, scale)

    keys = iter(jax.random.split(key, 12 * n_layers + 16))

    layer_params = []
    for l in range(n_layers):
        in_dim = input_size if l == 0 else H
        wir = u(next(keys), (in_dim, H))
        wiz = u(next(keys), (in_dim, H))
        win = u(next(keys), (in_dim, H))
        whr = u(next(keys), (H, H))
        whz = u(next(keys), (H, H))
        whn = u(next(keys), (H, H))
        b_ir, b_iz, b_in = (u(next(keys), (1, H)) for _ in range(3))
        b_hr, b_hz, b_hn = (u(next(keys), (1, H)) for _ in range(3))
        layer_params.append((wir, wiz, win, whr, whz, whn,
                             b_ir, b_iz, b_in, b_hr, b_hz, b_hn))

    # heads (nn.Linear weights pre-transposed to (in, out))
    w1c = u(next(keys), (H, n_pose));       b1c = u(next(keys), (1, n_pose))
    w2c = u(next(keys), (n_pose, n_class)); b2c = u(next(keys), (1, n_class))
    w1p = u(next(keys), (H, n_class));      b1p = u(next(keys), (1, n_class))
    w2p = u(next(keys), (n_class, n_pose)); b2p = u(next(keys), (1, n_pose))
    head_params = (w1c, b1c, w2c, b2c, w1p, b1p, w2p, b2p)
    return layer_params, head_params


# --------------------------------------------------------------------------
if __name__ == "__main__":
    seq_len = 8
    batch = 4
    input_size = 16
    hid_dim = 32
    n_class = 8
    n_pose = 16
    n_layers = 2

    key = jax.random.PRNGKey(0)
    kx, kp = jax.random.split(key)
    x = jax.random.normal(kx, (seq_len, batch, input_size), jnp.float32)
    layer_params, head_params = init_params(
        kp, input_size, hid_dim, n_class, n_pose, n_layers)

    class_out, pose_out, hidden = decoder0_forward(
        x, layer_params, head_params, hid_dim, n_class, n_pose)
    jax.block_until_ready((class_out, pose_out, hidden))

    # correctness check vs pure-JAX reference
    ref_c, ref_p, ref_h = decoder0_ref(x, layer_params, head_params, hid_dim)
    np.testing.assert_allclose(np.asarray(class_out), np.asarray(ref_c),
                               rtol=1e-5, atol=1e-5)
    np.testing.assert_allclose(np.asarray(pose_out), np.asarray(ref_p),
                               rtol=1e-5, atol=1e-5)
    np.testing.assert_allclose(np.asarray(hidden), np.asarray(ref_h),
                               rtol=1e-5, atol=1e-5)

    print("KERNEL_OK")
</pallas_src>

<mosaic_0001>
module attributes {stable_mosaic.version = 11 : i64} {
  func.func @kernel(%arg0: i32, %arg1: memref<64x16xf32, #tpu.memory_space<vmem>>, %arg2: memref<16x96xf32, #tpu.memory_space<vmem>>, %arg3: memref<32x96xf32, #tpu.memory_space<vmem>>, %arg4: memref<1x96xf32, #tpu.memory_space<vmem>>, %arg5: memref<1x96xf32, #tpu.memory_space<vmem>>, %arg6: memref<32x96xf32, #tpu.memory_space<vmem>>, %arg7: memref<32x96xf32, #tpu.memory_space<vmem>>, %arg8: memref<1x96xf32, #tpu.memory_space<vmem>>, %arg9: memref<1x96xf32, #tpu.memory_space<vmem>>, %arg10: memref<32x24xf32, #tpu.memory_space<vmem>>, %arg11: memref<1x24xf32, #tpu.memory_space<vmem>>, %arg12: memref<24x24xf32, #tpu.memory_space<vmem>>, %arg13: memref<1x24xf32, #tpu.memory_space<vmem>>, %arg14: memref<64x56xf32, #tpu.memory_space<vmem>>, %arg15: memref<64x96xf32, #tpu.memory_space<vmem>>, %arg16: memref<64x32xf32, #tpu.memory_space<vmem>>) attributes {dimension_semantics = [#tpu.dimension_semantics<arbitrary>], iteration_bounds = array<i64: 1>, scalar_prefetch = 0 : i64, scratch_operands = 2 : i64, tpu.core_type = #tpu.core_type<tc>, window_params = [{pipeline_mode = #tpu.pipeline_mode<synchronous>, transform_indices = @transform_0, window_bounds = array<i64: 64, 16>}, {pipeline_mode = #tpu.pipeline_mode<synchronous>, transform_indices = @transform_1, window_bounds = array<i64: 16, 96>}, {pipeline_mode = #tpu.pipeline_mode<synchronous>, transform_indices = @transform_2, window_bounds = array<i64: 32, 96>}, {pipeline_mode = #tpu.pipeline_mode<synchronous>, transform_indices = @transform_3, window_bounds = array<i64: 1, 96>}, {pipeline_mode = #tpu.pipeline_mode<synchronous>, transform_indices = @transform_4, window_bounds = array<i64: 1, 96>}, {pipeline_mode = #tpu.pipeline_mode<synchronous>, transform_indices = @transform_5, window_bounds = array<i64: 32, 96>}, {pipeline_mode = #tpu.pipeline_mode<synchronous>, transform_indices = @transform_6, window_bounds = array<i64: 32, 96>}, {pipeline_mode = #tpu.pipeline_mode<synchronous>, transform_indices = @transform_7, window_bounds = array<i64: 1, 96>}, {pipeline_mode = #tpu.pipeline_mode<synchronous>, transform_indices = @transform_8, window_bounds = array<i64: 1, 96>}, {pipeline_mode = #tpu.pipeline_mode<synchronous>, transform_indices = @transform_9, window_bounds = array<i64: 32, 24>}, {pipeline_mode = #tpu.pipeline_mode<synchronous>, transform_indices = @transform_10, window_bounds = array<i64: 1, 24>}, {pipeline_mode = #tpu.pipeline_mode<synchronous>, transform_indices = @transform_11, window_bounds = array<i64: 24, 24>}, {pipeline_mode = #tpu.pipeline_mode<synchronous>, transform_indices = @transform_12, window_bounds = array<i64: 1, 24>}, {pipeline_mode = #tpu.pipeline_mode<synchronous>, transform_indices = @transform_13, window_bounds = array<i64: 64, 56>}]} {
    %c0 = arith.constant 0 : index
    %c0_0 = arith.constant 0 : index
    %0 = vector.load %arg1[%c0, %c0_0] : memref<64x16xf32, #tpu.memory_space<vmem>>, vector<64x16xf32>
    %c0_1 = arith.constant 0 : index
    %c0_2 = arith.constant 0 : index
    %1 = vector.load %arg2[%c0_1, %c0_2] : memref<16x96xf32, #tpu.memory_space<vmem>>, vector<16x96xf32>
    %cst = arith.constant dense<0.000000e+00> : vector<64x96xf32>
    %2 = tpu.matmul %0, %1, %cst {dimension_numbers = #tpu.dot_dimension_numbers<[1], [0], [0], [1], [0, 0, 1, 1], [], []>} : vector<64x16xf32>, vector<16x96xf32>, vector<64x96xf32> -> vector<64x96xf32>
    %c0_3 = arith.constant 0 : index
    %c0_4 = arith.constant 0 : index
    %3 = vector.load %arg4[%c0_3, %c0_4] : memref<1x96xf32, #tpu.memory_space<vmem>>, vector<1x96xf32>
    %4 = vector.broadcast %3 : vector<1x96xf32> to vector<64x96xf32>
    %5 = arith.addf %2, %4 : vector<64x96xf32>
    %c0_5 = arith.constant 0 : index
    %c0_6 = arith.constant 0 : index
    %6 = vector.load %arg15[%c0_5, %c0_6] : memref<64x96xf32, #tpu.memory_space<vmem>>, vector<64x96xf32>
    tpu.vector_store %arg15[%c0_5, %c0_6], %5 {strides = array<i32>} : memref<64x96xf32, #tpu.memory_space<vmem>>, vector<64x96xf32>,
    %c0_7 = arith.constant 0 : index
    %c0_8 = arith.constant 0 : index
    %7 = vector.load %arg3[%c0_7, %c0_8] : memref<32x96xf32, #tpu.memory_space<vmem>>, vector<32x96xf32>
    %c0_9 = arith.constant 0 : index
    %c0_10 = arith.constant 0 : index
    %8 = vector.load %arg5[%c0_9, %c0_10] : memref<1x96xf32, #tpu.memory_space<vmem>>, vector<1x96xf32>
    %cst_11 = arith.constant 0.000000e+00 : f32
    %9 = vector.broadcast %cst_11 : f32 to vector<8x32xf32>
    %c0_i32 = arith.constant 0 : i32
    %c8_i32 = arith.constant 8 : i32
    %10 = arith.muli %c0_i32, %c8_i32 : i32
    %11 = tpu.assume_multiple %10, 8 : i32
    %12 = arith.index_cast %11 : i32 to index
    %c0_12 = arith.constant 0 : index
    %13 = vector.load %arg15[%12, %c0_12] : memref<64x96xf32, #tpu.memory_space<vmem>>, vector<8x96xf32>
    %cst_13 = arith.constant dense<0.000000e+00> : vector<8x96xf32>
    %14 = tpu.matmul %9, %7, %cst_13 {dimension_numbers = #tpu.dot_dimension_numbers<[1], [0], [0], [1], [0, 0, 1, 1], [], []>} : vector<8x32xf32>, vector<32x96xf32>, vector<8x96xf32> -> vector<8x96xf32>
    %15 = vector.broadcast %8 : vector<1x96xf32> to vector<8x96xf32>
    %16 = arith.addf %14, %15 : vector<8x96xf32>
    %17 = vector.extract_strided_slice %13 {offsets = [0, 0], sizes = [8, 32], strides = [1, 1]} : vector<8x96xf32> to vector<8x32xf32>
    %18 = vector.extract_strided_slice %16 {offsets = [0, 0], sizes = [8, 32], strides = [1, 1]} : vector<8x96xf32> to vector<8x32xf32>
    %19 = arith.addf %17, %18 : vector<8x32xf32>
    %20 = arith.negf %19 : vector<8x32xf32>
    %21 = math.exp %20 : vector<8x32xf32>
    %cst_14 = arith.constant 1.000000e+00 : f32
    %22 = vector.broadcast %cst_14 : f32 to vector<8x32xf32>
    %23 = arith.addf %22, %21 : vector<8x32xf32>
    %24 = arith.divf %22, %23 : vector<8x32xf32>
    %25 = vector.extract_strided_slice %13 {offsets = [0, 32], sizes = [8, 32], strides = [1, 1]} : vector<8x96xf32> to vector<8x32xf32>
    %26 = vector.extract_strided_slice %16 {offsets = [0, 32], sizes = [8, 32], strides = [1, 1]} : vector<8x96xf32> to vector<8x32xf32>
    %27 = arith.addf %25, %26 : vector<8x32xf32>
    %28 = arith.negf %27 : vector<8x32xf32>
    %29 = math.exp %28 : vector<8x32xf32>
    %cst_15 = arith.constant 1.000000e+00 : f32
    %30 = vector.broadcast %cst_15 : f32 to vector<8x32xf32>
    %31 = arith.addf %30, %29 : vector<8x32xf32>
    %32 = arith.divf %30, %31 : vector<8x32xf32>
    %33 = vector.extract_strided_slice %13 {offsets = [0, 64], sizes = [8, 32], strides = [1, 1]} : vector<8x96xf32> to vector<8x32xf32>
    %34 = vector.extract_strided_slice %16 {offsets = [0, 64], sizes = [8, 32], strides = [1, 1]} : vector<8x96xf32> to vector<8x32xf32>
    %35 = arith.mulf %24, %34 : vector<8x32xf32>
    %36 = arith.addf %33, %35 : vector<8x32xf32>
    %37 = math.tanh %36 : vector<8x32xf32>
    %38 = arith.subf %9, %37 : vector<8x32xf32>
    %39 = arith.mulf %32, %38 : vector<8x32xf32>
    %40 = arith.addf %37, %39 : vector<8x32xf32>
    %41 = arith.index_cast %11 : i32 to index
    %c0_16 = arith.constant 0 : index
    %42 = vector.load %arg16[%41, %c0_16] : memref<64x32xf32, #tpu.memory_space<vmem>>, vector<8x32xf32>
    tpu.vector_store %arg16[%41, %c0_16], %40 {strides = array<i32>} : memref<64x32xf32, #tpu.memory_space<vmem>>, vector<8x32xf32>,
    %c1_i32 = arith.constant 1 : i32
    %c8_i32_17 = arith.constant 8 : i32
    %43 = arith.muli %c1_i32, %c8_i32_17 : i32
    %44 = tpu.assume_multiple %43, 8 : i32
    %45 = arith.index_cast %44 : i32 to index
    %c0_18 = arith.constant 0 : index
    %46 = vector.load %arg15[%45, %c0_18] : memref<64x96xf32, #tpu.memory_space<vmem>>, vector<8x96xf32>
    %cst_19 = arith.constant dense<0.000000e+00> : vector<8x96xf32>
    %47 = tpu.matmul %40, %7, %cst_19 {dimension_numbers = #tpu.dot_dimension_numbers<[1], [0], [0], [1], [0, 0, 1, 1], [], []>} : vector<8x32xf32>, vector<32x96xf32>, vector<8x96xf32> -> vector<8x96xf32>
    %48 = vector.broadcast %8 : vector<1x96xf32> to vector<8x96xf32>
    %49 = arith.addf %47, %48 : vector<8x96xf32>
    %50 = vector.extract_strided_slice %46 {offsets = [0, 0], sizes = [8, 32], strides = [1, 1]} : vector<8x96xf32> to vector<8x32xf32>
    %51 = vector.extract_strided_slice %49 {offsets = [0, 0], sizes = [8, 32], strides = [1, 1]} : vector<8x96xf32> to vector<8x32xf32>
    %52 = arith.addf %50, %51 : vector<8x32xf32>
    %53 = arith.negf %52 : vector<8x32xf32>
    %54 = math.exp %53 : vector<8x32xf32>
    %cst_20 = arith.constant 1.000000e+00 : f32
    %55 = vector.broadcast %cst_20 : f32 to vector<8x32xf32>
    %56 = arith.addf %55, %54 : vector<8x32xf32>
    %57 = arith.divf %55, %56 : vector<8x32xf32>
    %58 = vector.extract_strided_slice %46 {offsets = [0, 32], sizes = [8, 32], strides = [1, 1]} : vector<8x96xf32> to vector<8x32xf32>
    %59 = vector.extract_strided_slice %49 {offsets = [0, 32], sizes = [8, 32], strides = [1, 1]} : vector<8x96xf32> to vector<8x32xf32>
    %60 = arith.addf %58, %59 : vector<8x32xf32>
    %61 = arith.negf %60 : vector<8x32xf32>
    %62 = math.exp %61 : vector<8x32xf32>
    %cst_21 = arith.constant 1.000000e+00 : f32
    %63 = vector.broadcast %cst_21 : f32 to vector<8x32xf32>
    %64 = arith.addf %63, %62 : vector<8x32xf32>
    %65 = arith.divf %63, %64 : vector<8x32xf32>
    %66 = vector.extract_strided_slice %46 {offsets = [0, 64], sizes = [8, 32], strides = [1, 1]} : vector<8x96xf32> to vector<8x32xf32>
    %67 = vector.extract_strided_slice %49 {offsets = [0, 64], sizes = [8, 32], strides = [1, 1]} : vector<8x96xf32> to vector<8x32xf32>
    %68 = arith.mulf %57, %67 : vector<8x32xf32>
    %69 = arith.addf %66, %68 : vector<8x32xf32>
    %70 = math.tanh %69 : vector<8x32xf32>
    %71 = arith.subf %40, %70 : vector<8x32xf32>
    %72 = arith.mulf %65, %71 : vector<8x32xf32>
    %73 = arith.addf %70, %72 : vector<8x32xf32>
    %74 = arith.index_cast %44 : i32 to index
    %c0_22 = arith.constant 0 : index
    %75 = vector.load %arg16[%74, %c0_22] : memref<64x32xf32, #tpu.memory_space<vmem>>, vector<8x32xf32>
    tpu.vector_store %arg16[%74, %c0_22], %73 {strides = array<i32>} : memref<64x32xf32, #tpu.memory_space<vmem>>, vector<8x32xf32>,
    %c2_i32 = arith.constant 2 : i32
    %c8_i32_23 = arith.constant 8 : i32
    %76 = arith.muli %c2_i32, %c8_i32_23 : i32
    %77 = tpu.assume_multiple %76, 8 : i32
    %78 = arith.index_cast %77 : i32 to index
    %c0_24 = arith.constant 0 : index
    %79 = vector.load %arg15[%78, %c0_24] : memref<64x96xf32, #tpu.memory_space<vmem>>, vector<8x96xf32>
    %cst_25 = arith.constant dense<0.000000e+00> : vector<8x96xf32>
    %80 = tpu.matmul %73, %7, %cst_25 {dimension_numbers = #tpu.dot_dimension_numbers<[1], [0], [0], [1], [0, 0, 1, 1], [], []>} : vector<8x32xf32>, vector<32x96xf32>, vector<8x96xf32> -> vector<8x96xf32>
    %81 = vector.broadcast %8 : vector<1x96xf32> to vector<8x96xf32>
    %82 = arith.addf %80, %81 : vector<8x96xf32>
    %83 = vector.extract_strided_slice %79 {offsets = [0, 0], sizes = [8, 32], strides = [1, 1]} : vector<8x96xf32> to vector<8x32xf32>
    %84 = vector.extract_strided_slice %82 {offsets = [0, 0], sizes = [8, 32], strides = [1, 1]} : vector<8x96xf32> to vector<8x32xf32>
    %85 = arith.addf %83, %84 : vector<8x32xf32>
    %86 = arith.negf %85 : vector<8x32xf32>
    %87 = math.exp %86 : vector<8x32xf32>
    %cst_26 = arith.constant 1.000000e+00 : f32
    %88 = vector.broadcast %cst_26 : f32 to vector<8x32xf32>
    %89 = arith.addf %88, %87 : vector<8x32xf32>
    %90 = arith.divf %88, %89 : vector<8x32xf32>
    %91 = vector.extract_strided_slice %79 {offsets = [0, 32], sizes = [8, 32], strides = [1, 1]} : vector<8x96xf32> to vector<8x32xf32>
    %92 = vector.extract_strided_slice %82 {offsets = [0, 32], sizes = [8, 32], strides = [1, 1]} : vector<8x96xf32> to vector<8x32xf32>
    %93 = arith.addf %91, %92 : vector<8x32xf32>
    %94 = arith.negf %93 : vector<8x32xf32>
    %95 = math.exp %94 : vector<8x32xf32>
    %cst_27 = arith.constant 1.000000e+00 : f32
    %96 = vector.broadcast %cst_27 : f32 to vector<8x32xf32>
    %97 = arith.addf %96, %95 : vector<8x32xf32>
    %98 = arith.divf %96, %97 : vector<8x32xf32>
    %99 = vector.extract_strided_slice %79 {offsets = [0, 64], sizes = [8, 32], strides = [1, 1]} : vector<8x96xf32> to vector<8x32xf32>
    %100 = vector.extract_strided_slice %82 {offsets = [0, 64], sizes = [8, 32], strides = [1, 1]} : vector<8x96xf32> to vector<8x32xf32>
    %101 = arith.mulf %90, %100 : vector<8x32xf32>
    %102 = arith.addf %99, %101 : vector<8x32xf32>
    %103 = math.tanh %102 : vector<8x32xf32>
    %104 = arith.subf %73, %103 : vector<8x32xf32>
    %105 = arith.mulf %98, %104 : vector<8x32xf32>
    %106 = arith.addf %103, %105 : vector<8x32xf32>
    %107 = arith.index_cast %77 : i32 to index
    %c0_28 = arith.constant 0 : index
    %108 = vector.load %arg16[%107, %c0_28] : memref<64x32xf32, #tpu.memory_space<vmem>>, vector<8x32xf32>
    tpu.vector_store %arg16[%107, %c0_28], %106 {strides = array<i32>} : memref<64x32xf32, #tpu.memory_space<vmem>>, vector<8x32xf32>,
    %c3_i32 = arith.constant 3 : i32
    %c8_i32_29 = arith.constant 8 : i32
    %109 = arith.muli %c3_i32, %c8_i32_29 : i32
    %110 = tpu.assume_multiple %109, 8 : i32
    %111 = arith.index_cast %110 : i32 to index
    %c0_30 = arith.constant 0 : index
    %112 = vector.load %arg15[%111, %c0_30] : memref<64x96xf32, #tpu.memory_space<vmem>>, vector<8x96xf32>
    %cst_31 = arith.constant dense<0.000000e+00> : vector<8x96xf32>
    %113 = tpu.matmul %106, %7, %cst_31 {dimension_numbers = #tpu.dot_dimension_numbers<[1], [0], [0], [1], [0, 0, 1, 1], [], []>} : vector<8x32xf32>, vector<32x96xf32>, vector<8x96xf32> -> vector<8x96xf32>
    %114 = vector.broadcast %8 : vector<1x96xf32> to vector<8x96xf32>
    %115 = arith.addf %113, %114 : vector<8x96xf32>
    %116 = vector.extract_strided_slice %112 {offsets = [0, 0], sizes = [8, 32], strides = [1, 1]} : vector<8x96xf32> to vector<8x32xf32>
    %117 = vector.extract_strided_slice %115 {offsets = [0, 0], sizes = [8, 32], strides = [1, 1]} : vector<8x96xf32> to vector<8x32xf32>
    %118 = arith.addf %116, %117 : vector<8x32xf32>
    %119 = arith.negf %118 : vector<8x32xf32>
    %120 = math.exp %119 : vector<8x32xf32>
    %cst_32 = arith.constant 1.000000e+00 : f32
    %121 = vector.broadcast %cst_32 : f32 to vector<8x32xf32>
    %122 = arith.addf %121, %120 : vector<8x32xf32>
    %123 = arith.divf %121, %122 : vector<8x32xf32>
    %124 = vector.extract_strided_slice %112 {offsets = [0, 32], sizes = [8, 32], strides = [1, 1]} : vector<8x96xf32> to vector<8x32xf32>
    %125 = vector.extract_strided_slice %115 {offsets = [0, 32], sizes = [8, 32], strides = [1, 1]} : vector<8x96xf32> to vector<8x32xf32>
    %126 = arith.addf %124, %125 : vector<8x32xf32>
    %127 = arith.negf %126 : vector<8x32xf32>
    %128 = math.exp %127 : vector<8x32xf32>
    %cst_33 = arith.constant 1.000000e+00 : f32
    %129 = vector.broadcast %cst_33 : f32 to vector<8x32xf32>
    %130 = arith.addf %129, %128 : vector<8x32xf32>
    %131 = arith.divf %129, %130 : vector<8x32xf32>
    %132 = vector.extract_strided_slice %112 {offsets = [0, 64], sizes = [8, 32], strides = [1, 1]} : vector<8x96xf32> to vector<8x32xf32>
    %133 = vector.extract_strided_slice %115 {offsets = [0, 64], sizes = [8, 32], strides = [1, 1]} : vector<8x96xf32> to vector<8x32xf32>
    %134 = arith.mulf %123, %133 : vector<8x32xf32>
    %135 = arith.addf %132, %134 : vector<8x32xf32>
    %136 = math.tanh %135 : vector<8x32xf32>
    %137 = arith.subf %106, %136 : vector<8x32xf32>
    %138 = arith.mulf %131, %137 : vector<8x32xf32>
    %139 = arith.addf %136, %138 : vector<8x32xf32>
    %140 = arith.index_cast %110 : i32 to index
    %c0_34 = arith.constant 0 : index
    %141 = vector.load %arg16[%140, %c0_34] : memref<64x32xf32, #tpu.memory_space<vmem>>, vector<8x32xf32>
    tpu.vector_store %arg16[%140, %c0_34], %139 {strides = array<i32>} : memref<64x32xf32, #tpu.memory_space<vmem>>, vector<8x32xf32>,
    %c4_i32 = arith.constant 4 : i32
    %c8_i32_35 = arith.constant 8 : i32
    %142 = arith.muli %c4_i32, %c8_i32_35 : i32
    %143 = tpu.assume_multiple %142, 8 : i32
    %144 = arith.index_cast %143 : i32 to index
    %c0_36 = arith.constant 0 : index
    %145 = vector.load %arg15[%144, %c0_36] : memref<64x96xf32, #tpu.memory_space<vmem>>, vector<8x96xf32>
    %cst_37 = arith.constant dense<0.000000e+00> : vector<8x96xf32>
    %146 = tpu.matmul %139, %7, %cst_37 {dimension_numbers = #tpu.dot_dimension_numbers<[1], [0], [0], [1], [0, 0, 1, 1], [], []>} : vector<8x32xf32>, vector<32x96xf32>, vector<8x96xf32> -> vector<8x96xf32>
    %147 = vector.broadcast %8 : vector<1x96xf32> to vector<8x96xf32>
    %148 = arith.addf %146, %147 : vector<8x96xf32>
    %149 = vector.extract_strided_slice %145 {offsets = [0, 0], sizes = [8, 32], strides = [1, 1]} : vector<8x96xf32> to vector<8x32xf32>
    %150 = vector.extract_strided_slice %148 {offsets = [0, 0], sizes = [8, 32], strides = [1, 1]} : vector<8x96xf32> to vector<8x32xf32>
    %151 = arith.addf %149, %150 : vector<8x32xf32>
    %152 = arith.negf %151 : vector<8x32xf32>
    %153 = math.exp %152 : vector<8x32xf32>
    %cst_38 = arith.constant 1.000000e+00 : f32
    %154 = vector.broadcast %cst_38 : f32 to vector<8x32xf32>
    %155 = arith.addf %154, %153 : vector<8x32xf32>
    %156 = arith.divf %154, %155 : vector<8x32xf32>
    %157 = vector.extract_strided_slice %145 {offsets = [0, 32], sizes = [8, 32], strides = [1, 1]} : vector<8x96xf32> to vector<8x32xf32>
    %158 = vector.extract_strided_slice %148 {offsets = [0, 32], sizes = [8, 32], strides = [1, 1]} : vector<8x96xf32> to vector<8x32xf32>
    %159 = arith.addf %157, %158 : vector<8x32xf32>
    %160 = arith.negf %159 : vector<8x32xf32>
    %161 = math.exp %160 : vector<8x32xf32>
    %cst_39 = arith.constant 1.000000e+00 : f32
    %162 = vector.broadcast %cst_39 : f32 to vector<8x32xf32>
    %163 = arith.addf %162, %161 : vector<8x32xf32>
    %164 = arith.divf %162, %163 : vector<8x32xf32>
    %165 = vector.extract_strided_slice %145 {offsets = [0, 64], sizes = [8, 32], strides = [1, 1]} : vector<8x96xf32> to vector<8x32xf32>
    %166 = vector.extract_strided_slice %148 {offsets = [0, 64], sizes = [8, 32], strides = [1, 1]} : vector<8x96xf32> to vector<8x32xf32>
    %167 = arith.mulf %156, %166 : vector<8x32xf32>
    %168 = arith.addf %165, %167 : vector<8x32xf32>
    %169 = math.tanh %168 : vector<8x32xf32>
    %170 = arith.subf %139, %169 : vector<8x32xf32>
    %171 = arith.mulf %164, %170 : vector<8x32xf32>
    %172 = arith.addf %169, %171 : vector<8x32xf32>
    %173 = arith.index_cast %143 : i32 to index
    %c0_40 = arith.constant 0 : index
    %174 = vector.load %arg16[%173, %c0_40] : memref<64x32xf32, #tpu.memory_space<vmem>>, vector<8x32xf32>
    tpu.vector_store %arg16[%173, %c0_40], %172 {strides = array<i32>} : memref<64x32xf32, #tpu.memory_space<vmem>>, vector<8x32xf32>,
    %c5_i32 = arith.constant 5 : i32
    %c8_i32_41 = arith.constant 8 : i32
    %175 = arith.muli %c5_i32, %c8_i32_41 : i32
    %176 = tpu.assume_multiple %175, 8 : i32
    %177 = arith.index_cast %176 : i32 to index
    %c0_42 = arith.constant 0 : index
    %178 = vector.load %arg15[%177, %c0_42] : memref<64x96xf32, #tpu.memory_space<vmem>>, vector<8x96xf32>
    %cst_43 = arith.constant dense<0.000000e+00> : vector<8x96xf32>
    %179 = tpu.matmul %172, %7, %cst_43 {dimension_numbers = #tpu.dot_dimension_numbers<[1], [0], [0], [1], [0, 0, 1, 1], [], []>} : vector<8x32xf32>, vector<32x96xf32>, vector<8x96xf32> -> vector<8x96xf32>
    %180 = vector.broadcast %8 : vector<1x96xf32> to vector<8x96xf32>
    %181 = arith.addf %179, %180 : vector<8x96xf32>
    %182 = vector.extract_strided_slice %178 {offsets = [0, 0], sizes = [8, 32], strides = [1, 1]} : vector<8x96xf32> to vector<8x32xf32>
    %183 = vector.extract_strided_slice %181 {offsets = [0, 0], sizes = [8, 32], strides = [1, 1]} : vector<8x96xf32> to vector<8x32xf32>
    %184 = arith.addf %182, %183 : vector<8x32xf32>
    %185 = arith.negf %184 : vector<8x32xf32>
    %186 = math.exp %185 : vector<8x32xf32>
    %cst_44 = arith.constant 1.000000e+00 : f32
    %187 = vector.broadcast %cst_44 : f32 to vector<8x32xf32>
    %188 = arith.addf %187, %186 : vector<8x32xf32>
    %189 = arith.divf %187, %188 : vector<8x32xf32>
    %190 = vector.extract_strided_slice %178 {offsets = [0, 32], sizes = [8, 32], strides = [1, 1]} : vector<8x96xf32> to vector<8x32xf32>
    %191 = vector.extract_strided_slice %181 {offsets = [0, 32], sizes = [8, 32], strides = [1, 1]} : vector<8x96xf32> to vector<8x32xf32>
    %192 = arith.addf %190, %191 : vector<8x32xf32>
    %193 = arith.negf %192 : vector<8x32xf32>
    %194 = math.exp %193 : vector<8x32xf32>
    %cst_45 = arith.constant 1.000000e+00 : f32
    %195 = vector.broadcast %cst_45 : f32 to vector<8x32xf32>
    %196 = arith.addf %195, %194 : vector<8x32xf32>
    %197 = arith.divf %195, %196 : vector<8x32xf32>
    %198 = vector.extract_strided_slice %178 {offsets = [0, 64], sizes = [8, 32], strides = [1, 1]} : vector<8x96xf32> to vector<8x32xf32>
    %199 = vector.extract_strided_slice %181 {offsets = [0, 64], sizes = [8, 32], strides = [1, 1]} : vector<8x96xf32> to vector<8x32xf32>
    %200 = arith.mulf %189, %199 : vector<8x32xf32>
    %201 = arith.addf %198, %200 : vector<8x32xf32>
    %202 = math.tanh %201 : vector<8x32xf32>
    %203 = arith.subf %172, %202 : vector<8x32xf32>
    %204 = arith.mulf %197, %203 : vector<8x32xf32>
    %205 = arith.addf %202, %204 : vector<8x32xf32>
    %206 = arith.index_cast %176 : i32 to index
    %c0_46 = arith.constant 0 : index
    %207 = vector.load %arg16[%206, %c0_46] : memref<64x32xf32, #tpu.memory_space<vmem>>, vector<8x32xf32>
    tpu.vector_store %arg16[%206, %c0_46], %205 {strides = array<i32>} : memref<64x32xf32, #tpu.memory_space<vmem>>, vector<8x32xf32>,
    %c6_i32 = arith.constant 6 : i32
    %c8_i32_47 = arith.constant 8 : i32
    %208 = arith.muli %c6_i32, %c8_i32_47 : i32
    %209 = tpu.assume_multiple %208, 8 : i32
    %210 = arith.index_cast %209 : i32 to index
    %c0_48 = arith.constant 0 : index
    %211 = vector.load %arg15[%210, %c0_48] : memref<64x96xf32, #tpu.memory_space<vmem>>, vector<8x96xf32>
    %cst_49 = arith.constant dense<0.000000e+00> : vector<8x96xf32>
    %212 = tpu.matmul %205, %7, %cst_49 {dimension_numbers = #tpu.dot_dimension_numbers<[1], [0], [0], [1], [0, 0, 1, 1], [], []>} : vector<8x32xf32>, vector<32x96xf32>, vector<8x96xf32> -> vector<8x96xf32>
    %213 = vector.broadcast %8 : vector<1x96xf32> to vector<8x96xf32>
    %214 = arith.addf %212, %213 : vector<8x96xf32>
    %215 = vector.extract_strided_slice %211 {offsets = [0, 0], sizes = [8, 32], strides = [1, 1]} : vector<8x96xf32> to vector<8x32xf32>
    %216 = vector.extract_strided_slice %214 {offsets = [0, 0], sizes = [8, 32], strides = [1, 1]} : vector<8x96xf32> to vector<8x32xf32>
    %217 = arith.addf %215, %216 : vector<8x32xf32>
    %218 = arith.negf %217 : vector<8x32xf32>
    %219 = math.exp %218 : vector<8x32xf32>
    %cst_50 = arith.constant 1.000000e+00 : f32
    %220 = vector.broadcast %cst_50 : f32 to vector<8x32xf32>
    %221 = arith.addf %220, %219 : vector<8x32xf32>
    %222 = arith.divf %220, %221 : vector<8x32xf32>
    %223 = vector.extract_strided_slice %211 {offsets = [0, 32], sizes = [8, 32], strides = [1, 1]} : vector<8x96xf32> to vector<8x32xf32>
    %224 = vector.extract_strided_slice %214 {offsets = [0, 32], sizes = [8, 32], strides = [1, 1]} : vector<8x96xf32> to vector<8x32xf32>
    %225 = arith.addf %223, %224 : vector<8x32xf32>
    %226 = arith.negf %225 : vector<8x32xf32>
    %227 = math.exp %226 : vector<8x32xf32>
    %cst_51 = arith.constant 1.000000e+00 : f32
    %228 = vector.broadcast %cst_51 : f32 to vector<8x32xf32>
    %229 = arith.addf %228, %227 : vector<8x32xf32>
    %230 = arith.divf %228, %229 : vector<8x32xf32>
    %231 = vector.extract_strided_slice %211 {offsets = [0, 64], sizes = [8, 32], strides = [1, 1]} : vector<8x96xf32> to vector<8x32xf32>
    %232 = vector.extract_strided_slice %214 {offsets = [0, 64], sizes = [8, 32], strides = [1, 1]} : vector<8x96xf32> to vector<8x32xf32>
    %233 = arith.mulf %222, %232 : vector<8x32xf32>
    %234 = arith.addf %231, %233 : vector<8x32xf32>
    %235 = math.tanh %234 : vector<8x32xf32>
    %236 = arith.subf %205, %235 : vector<8x32xf32>
    %237 = arith.mulf %230, %236 : vector<8x32xf32>
    %238 = arith.addf %235, %237 : vector<8x32xf32>
    %239 = arith.index_cast %209 : i32 to index
    %c0_52 = arith.constant 0 : index
    %240 = vector.load %arg16[%239, %c0_52] : memref<64x32xf32, #tpu.memory_space<vmem>>, vector<8x32xf32>
    tpu.vector_store %arg16[%239, %c0_52], %238 {strides = array<i32>} : memref<64x32xf32, #tpu.memory_space<vmem>>, vector<8x32xf32>,
    %c7_i32 = arith.constant 7 : i32
    %c8_i32_53 = arith.constant 8 : i32
    %241 = arith.muli %c7_i32, %c8_i32_53 : i32
    %242 = tpu.assume_multiple %241, 8 : i32
    %243 = arith.index_cast %242 : i32 to index
    %c0_54 = arith.constant 0 : index
    %244 = vector.load %arg15[%243, %c0_54] : memref<64x96xf32, #tpu.memory_space<vmem>>, vector<8x96xf32>
    %cst_55 = arith.constant dense<0.000000e+00> : vector<8x96xf32>
    %245 = tpu.matmul %238, %7, %cst_55 {dimension_numbers = #tpu.dot_dimension_numbers<[1], [0], [0], [1], [0, 0, 1, 1], [], []>} : vector<8x32xf32>, vector<32x96xf32>, vector<8x96xf32> -> vector<8x96xf32>
    %246 = vector.broadcast %8 : vector<1x96xf32> to vector<8x96xf32>
    %247 = arith.addf %245, %246 : vector<8x96xf32>
    %248 = vector.extract_strided_slice %244 {offsets = [0, 0], sizes = [8, 32], strides = [1, 1]} : vector<8x96xf32> to vector<8x32xf32>
    %249 = vector.extract_strided_slice %247 {offsets = [0, 0], sizes = [8, 32], strides = [1, 1]} : vector<8x96xf32> to vector<8x32xf32>
    %250 = arith.addf %248, %249 : vector<8x32xf32>
    %251 = arith.negf %250 : vector<8x32xf32>
    %252 = math.exp %251 : vector<8x32xf32>
    %cst_56 = arith.constant 1.000000e+00 : f32
    %253 = vector.broadcast %cst_56 : f32 to vector<8x32xf32>
    %254 = arith.addf %253, %252 : vector<8x32xf32>
    %255 = arith.divf %253, %254 : vector<8x32xf32>
    %256 = vector.extract_strided_slice %244 {offsets = [0, 32], sizes = [8, 32], strides = [1, 1]} : vector<8x96xf32> to vector<8x32xf32>
    %257 = vector.extract_strided_slice %247 {offsets = [0, 32], sizes = [8, 32], strides = [1, 1]} : vector<8x96xf32> to vector<8x32xf32>
    %258 = arith.addf %256, %257 : vector<8x32xf32>
    %259 = arith.negf %258 : vector<8x32xf32>
    %260 = math.exp %259 : vector<8x32xf32>
    %cst_57 = arith.constant 1.000000e+00 : f32
    %261 = vector.broadcast %cst_57 : f32 to vector<8x32xf32>
    %262 = arith.addf %261, %260 : vector<8x32xf32>
    %263 = arith.divf %261, %262 : vector<8x32xf32>
    %264 = vector.extract_strided_slice %244 {offsets = [0, 64], sizes = [8, 32], strides = [1, 1]} : vector<8x96xf32> to vector<8x32xf32>
    %265 = vector.extract_strided_slice %247 {offsets = [0, 64], sizes = [8, 32], strides = [1, 1]} : vector<8x96xf32> to vector<8x32xf32>
    %266 = arith.mulf %255, %265 : vector<8x32xf32>
    %267 = arith.addf %264, %266 : vector<8x32xf32>
    %268 = math.tanh %267 : vector<8x32xf32>
    %269 = arith.subf %238, %268 : vector<8x32xf32>
    %270 = arith.mulf %263, %269 : vector<8x32xf32>
    %271 = arith.addf %268, %270 : vector<8x32xf32>
    %272 = arith.index_cast %242 : i32 to index
    %c0_58 = arith.constant 0 : index
    %273 = vector.load %arg16[%272, %c0_58] : memref<64x32xf32, #tpu.memory_space<vmem>>, vector<8x32xf32>
    tpu.vector_store %arg16[%272, %c0_58], %271 {strides = array<i32>} : memref<64x32xf32, #tpu.memory_space<vmem>>, vector<8x32xf32>,
    %c8_i32_59 = arith.constant 8 : i32
    %c0_60 = arith.constant 0 : index
    %c0_61 = arith.constant 0 : index
    %274 = vector.load %arg16[%c0_60, %c0_61] : memref<64x32xf32, #tpu.memory_space<vmem>>, vector<64x32xf32>
    %c0_62 = arith.constant 0 : index
    %c0_63 = arith.constant 0 : index
    %275 = vector.load %arg6[%c0_62, %c0_63] : memref<32x96xf32, #tpu.memory_space<vmem>>, vector<32x96xf32>
    %cst_64 = arith.constant dense<0.000000e+00> : vector<64x96xf32>
    %276 = tpu.matmul %274, %275, %cst_64 {dimension_numbers = #tpu.dot_dimension_numbers<[1], [0], [0], [1], [0, 0, 1, 1], [], []>} : vector<64x32xf32>, vector<32x96xf32>, vector<64x96xf32> -> vector<64x96xf32>
    %c0_65 = arith.constant 0 : index
    %c0_66 = arith.constant 0 : index
    %277 = vector.load %arg8[%c0_65, %c0_66] : memref<1x96xf32, #tpu.memory_space<vmem>>, vector<1x96xf32>
    %278 = vector.broadcast %277 : vector<1x96xf32> to vector<64x96xf32>
    %279 = arith.addf %276, %278 : vector<64x96xf32>
    %c0_67 = arith.constant 0 : index
    %c0_68 = arith.constant 0 : index
    %280 = vector.load %arg15[%c0_67, %c0_68] : memref<64x96xf32, #tpu.memory_space<vmem>>, vector<64x96xf32>
    tpu.vector_store %arg15[%c0_67, %c0_68], %279 {strides = array<i32>} : memref<64x96xf32, #tpu.memory_space<vmem>>, vector<64x96xf32>,
    %c0_69 = arith.constant 0 : index
    %c0_70 = arith.constant 0 : index
    %281 = vector.load %arg7[%c0_69, %c0_70] : memref<32x96xf32, #tpu.memory_space<vmem>>, vector<32x96xf32>
    %c0_71 = arith.constant 0 : index
    %c0_72 = arith.constant 0 : index
    %282 = vector.load %arg9[%c0_71, %c0_72] : memref<1x96xf32, #tpu.memory_space<vmem>>, vector<1x96xf32>
    %cst_73 = arith.constant 0.000000e+00 : f32
    %283 = vector.broadcast %cst_73 : f32 to vector<8x32xf32>
    %c0_i32_74 = arith.constant 0 : i32
    %c8_i32_75 = arith.constant 8 : i32
    %284 = arith.muli %c0_i32_74, %c8_i32_75 : i32
    %285 = tpu.assume_multiple %284, 8 : i32
    %286 = arith.index_cast %285 : i32 to index
    %c0_76 = arith.constant 0 : index
    %287 = vector.load %arg15[%286, %c0_76] : memref<64x96xf32, #tpu.memory_space<vmem>>, vector<8x96xf32>
    %cst_77 = arith.constant dense<0.000000e+00> : vector<8x96xf32>
    %288 = tpu.matmul %283, %281, %cst_77 {dimension_numbers = #tpu.dot_dimension_numbers<[1], [0], [0], [1], [0, 0, 1, 1], [], []>} : vector<8x32xf32>, vector<32x96xf32>, vector<8x96xf32> -> vector<8x96xf32>
    %289 = vector.broadcast %282 : vector<1x96xf32> to vector<8x96xf32>
    %290 = arith.addf %288, %289 : vector<8x96xf32>
    %291 = vector.extract_strided_slice %287 {offsets = [0, 0], sizes = [8, 32], strides = [1, 1]} : vector<8x96xf32> to vector<8x32xf32>
    %292 = vector.extract_strided_slice %290 {offsets = [0, 0], sizes = [8, 32], strides = [1, 1]} : vector<8x96xf32> to vector<8x32xf32>
    %293 = arith.addf %291, %292 : vector<8x32xf32>
    %294 = arith.negf %293 : vector<8x32xf32>
    %295 = math.exp %294 : vector<8x32xf32>
    %cst_78 = arith.constant 1.000000e+00 : f32
    %296 = vector.broadcast %cst_78 : f32 to vector<8x32xf32>
    %297 = arith.addf %296, %295 : vector<8x32xf32>
    %298 = arith.divf %296, %297 : vector<8x32xf32>
    %299 = vector.extract_strided_slice %287 {offsets = [0, 32], sizes = [8, 32], strides = [1, 1]} : vector<8x96xf32> to vector<8x32xf32>
    %300 = vector.extract_strided_slice %290 {offsets = [0, 32], sizes = [8, 32], strides = [1, 1]} : vector<8x96xf32> to vector<8x32xf32>
    %301 = arith.addf %299, %300 : vector<8x32xf32>
    %302 = arith.negf %301 : vector<8x32xf32>
    %303 = math.exp %302 : vector<8x32xf32>
    %cst_79 = arith.constant 1.000000e+00 : f32
    %304 = vector.broadcast %cst_79 : f32 to vector<8x32xf32>
    %305 = arith.addf %304, %303 : vector<8x32xf32>
    %306 = arith.divf %304, %305 : vector<8x32xf32>
    %307 = vector.extract_strided_slice %287 {offsets = [0, 64], sizes = [8, 32], strides = [1, 1]} : vector<8x96xf32> to vector<8x32xf32>
    %308 = vector.extract_strided_slice %290 {offsets = [0, 64], sizes = [8, 32], strides = [1, 1]} : vector<8x96xf32> to vector<8x32xf32>
    %309 = arith.mulf %298, %308 : vector<8x32xf32>
    %310 = arith.addf %307, %309 : vector<8x32xf32>
    %311 = math.tanh %310 : vector<8x32xf32>
    %312 = arith.subf %283, %311 : vector<8x32xf32>
    %313 = arith.mulf %306, %312 : vector<8x32xf32>
    %314 = arith.addf %311, %313 : vector<8x32xf32>
    %315 = arith.index_cast %285 : i32 to index
    %c0_80 = arith.constant 0 : index
    %316 = vector.load %arg16[%315, %c0_80] : memref<64x32xf32, #tpu.memory_space<vmem>>, vector<8x32xf32>
    tpu.vector_store %arg16[%315, %c0_80], %314 {strides = array<i32>} : memref<64x32xf32, #tpu.memory_space<vmem>>, vector<8x32xf32>,
    %c1_i32_81 = arith.constant 1 : i32
    %c8_i32_82 = arith.constant 8 : i32
    %317 = arith.muli %c1_i32_81, %c8_i32_82 : i32
    %318 = tpu.assume_multiple %317, 8 : i32
    %319 = arith.index_cast %318 : i32 to index
    %c0_83 = arith.constant 0 : index
    %320 = vector.load %arg15[%319, %c0_83] : memref<64x96xf32, #tpu.memory_space<vmem>>, vector<8x96xf32>
    %cst_84 = arith.constant dense<0.000000e+00> : vector<8x96xf32>
    %321 = tpu.matmul %314, %281, %cst_84 {dimension_numbers = #tpu.dot_dimension_numbers<[1], [0], [0], [1], [0, 0, 1, 1], [], []>} : vector<8x32xf32>, vector<32x96xf32>, vector<8x96xf32> -> vector<8x96xf32>
    %322 = vector.broadcast %282 : vector<1x96xf32> to vector<8x96xf32>
    %323 = arith.addf %321, %322 : vector<8x96xf32>
    %324 = vector.extract_strided_slice %320 {offsets = [0, 0], sizes = [8, 32], strides = [1, 1]} : vector<8x96xf32> to vector<8x32xf32>
    %325 = vector.extract_strided_slice %323 {offsets = [0, 0], sizes = [8, 32], strides = [1, 1]} : vector<8x96xf32> to vector<8x32xf32>
    %326 = arith.addf %324, %325 : vector<8x32xf32>
    %327 = arith.negf %326 : vector<8x32xf32>
    %328 = math.exp %327 : vector<8x32xf32>
    %cst_85 = arith.constant 1.000000e+00 : f32
    %329 = vector.broadcast %cst_85 : f32 to vector<8x32xf32>
    %330 = arith.addf %329, %328 : vector<8x32xf32>
    %331 = arith.divf %329, %330 : vector<8x32xf32>
    %332 = vector.extract_strided_slice %320 {offsets = [0, 32], sizes = [8, 32], strides = [1, 1]} : vector<8x96xf32> to vector<8x32xf32>
    %333 = vector.extract_strided_slice %323 {offsets = [0, 32], sizes = [8, 32], strides = [1, 1]} : vector<8x96xf32> to vector<8x32xf32>
    %334 = arith.addf %332, %333 : vector<8x32xf32>
    %335 = arith.negf %334 : vector<8x32xf32>
    %336 = math.exp %335 : vector<8x32xf32>
    %cst_86 = arith.constant 1.000000e+00 : f32
    %337 = vector.broadcast %cst_86 : f32 to vector<8x32xf32>
    %338 = arith.addf %337, %336 : vector<8x32xf32>
    %339 = arith.divf %337, %338 : vector<8x32xf32>
    %340 = vector.extract_strided_slice %320 {offsets = [0, 64], sizes = [8, 32], strides = [1, 1]} : vector<8x96xf32> to vector<8x32xf32>
    %341 = vector.extract_strided_slice %323 {offsets = [0, 64], sizes = [8, 32], strides = [1, 1]} : vector<8x96xf32> to vector<8x32xf32>
    %342 = arith.mulf %331, %341 : vector<8x32xf32>
    %343 = arith.addf %340, %342 : vector<8x32xf32>
    %344 = math.tanh %343 : vector<8x32xf32>
    %345 = arith.subf %314, %344 : vector<8x32xf32>
    %346 = arith.mulf %339, %345 : vector<8x32xf32>
    %347 = arith.addf %344, %346 : vector<8x32xf32>
    %348 = arith.index_cast %318 : i32 to index
    %c0_87 = arith.constant 0 : index
    %349 = vector.load %arg16[%348, %c0_87] : memref<64x32xf32, #tpu.memory_space<vmem>>, vector<8x32xf32>
    tpu.vector_store %arg16[%348, %c0_87], %347 {strides = array<i32>} : memref<64x32xf32, #tpu.memory_space<vmem>>, vector<8x32xf32>,
    %c2_i32_88 = arith.constant 2 : i32
    %c8_i32_89 = arith.constant 8 : i32
    %350 = arith.muli %c2_i32_88, %c8_i32_89 : i32
    %351 = tpu.assume_multiple %350, 8 : i32
    %352 = arith.index_cast %351 : i32 to index
    %c0_90 = arith.constant 0 : index
    %353 = vector.load %arg15[%352, %c0_90] : memref<64x96xf32, #tpu.memory_space<vmem>>, vector<8x96xf32>
    %cst_91 = arith.constant dense<0.000000e+00> : vector<8x96xf32>
    %354 = tpu.matmul %347, %281, %cst_91 {dimension_numbers = #tpu.dot_dimension_numbers<[1], [0], [0], [1], [0, 0, 1, 1], [], []>} : vector<8x32xf32>, vector<32x96xf32>, vector<8x96xf32> -> vector<8x96xf32>
    %355 = vector.broadcast %282 : vector<1x96xf32> to vector<8x96xf32>
    %356 = arith.addf %354, %355 : vector<8x96xf32>
    %357 = vector.extract_strided_slice %353 {offsets = [0, 0], sizes = [8, 32], strides = [1, 1]} : vector<8x96xf32> to vector<8x32xf32>
    %358 = vector.extract_strided_slice %356 {offsets = [0, 0], sizes = [8, 32], strides = [1, 1]} : vector<8x96xf32> to vector<8x32xf32>
    %359 = arith.addf %357, %358 : vector<8x32xf32>
    %360 = arith.negf %359 : vector<8x32xf32>
    %361 = math.exp %360 : vector<8x32xf32>
    %cst_92 = arith.constant 1.000000e+00 : f32
    %362 = vector.broadcast %cst_92 : f32 to vector<8x32xf32>
    %363 = arith.addf %362, %361 : vector<8x32xf32>
    %364 = arith.divf %362, %363 : vector<8x32xf32>
    %365 = vector.extract_strided_slice %353 {offsets = [0, 32], sizes = [8, 32], strides = [1, 1]} : vector<8x96xf32> to vector<8x32xf32>
    %366 = vector.extract_strided_slice %356 {offsets = [0, 32], sizes = [8, 32], strides = [1, 1]} : vector<8x96xf32> to vector<8x32xf32>
    %367 = arith.addf %365, %366 : vector<8x32xf32>
    %368 = arith.negf %367 : vector<8x32xf32>
    %369 = math.exp %368 : vector<8x32xf32>
    %cst_93 = arith.constant 1.000000e+00 : f32
    %370 = vector.broadcast %cst_93 : f32 to vector<8x32xf32>
    %371 = arith.addf %370, %369 : vector<8x32xf32>
    %372 = arith.divf %370, %371 : vector<8x32xf32>
    %373 = vector.extract_strided_slice %353 {offsets = [0, 64], sizes = [8, 32], strides = [1, 1]} : vector<8x96xf32> to vector<8x32xf32>
    %374 = vector.extract_strided_slice %356 {offsets = [0, 64], sizes = [8, 32], strides = [1, 1]} : vector<8x96xf32> to vector<8x32xf32>
    %375 = arith.mulf %364, %374 : vector<8x32xf32>
    %376 = arith.addf %373, %375 : vector<8x32xf32>
    %377 = math.tanh %376 : vector<8x32xf32>
    %378 = arith.subf %347, %377 : vector<8x32xf32>
    %379 = arith.mulf %372, %378 : vector<8x32xf32>
    %380 = arith.addf %377, %379 : vector<8x32xf32>
    %381 = arith.index_cast %351 : i32 to index
    %c0_94 = arith.constant 0 : index
    %382 = vector.load %arg16[%381, %c0_94] : memref<64x32xf32, #tpu.memory_space<vmem>>, vector<8x32xf32>
    tpu.vector_store %arg16[%381, %c0_94], %380 {strides = array<i32>} : memref<64x32xf32, #tpu.memory_space<vmem>>, vector<8x32xf32>,
    %c3_i32_95 = arith.constant 3 : i32
    %c8_i32_96 = arith.constant 8 : i32
    %383 = arith.muli %c3_i32_95, %c8_i32_96 : i32
    %384 = tpu.assume_multiple %383, 8 : i32
    %385 = arith.index_cast %384 : i32 to index
    %c0_97 = arith.constant 0 : index
    %386 = vector.load %arg15[%385, %c0_97] : memref<64x96xf32, #tpu.memory_space<vmem>>, vector<8x96xf32>
    %cst_98 = arith.constant dense<0.000000e+00> : vector<8x96xf32>
    %387 = tpu.matmul %380, %281, %cst_98 {dimension_numbers = #tpu.dot_dimension_numbers<[1], [0], [0], [1], [0, 0, 1, 1], [], []>} : vector<8x32xf32>, vector<32x96xf32>, vector<8x96xf32> -> vector<8x96xf32>
    %388 = vector.broadcast %282 : vector<1x96xf32> to vector<8x96xf32>
    %389 = arith.addf %387, %388 : vector<8x96xf32>
    %390 = vector.extract_strided_slice %386 {offsets = [0, 0], sizes = [8, 32], strides = [1, 1]} : vector<8x96xf32> to vector<8x32xf32>
    %391 = vector.extract_strided_slice %389 {offsets = [0, 0], sizes = [8, 32], strides = [1, 1]} : vector<8x96xf32> to vector<8x32xf32>
    %392 = arith.addf %390, %391 : vector<8x32xf32>
    %393 = arith.negf %392 : vector<8x32xf32>
    %394 = math.exp %393 : vector<8x32xf32>
    %cst_99 = arith.constant 1.000000e+00 : f32
    %395 = vector.broadcast %cst_99 : f32 to vector<8x32xf32>
    %396 = arith.addf %395, %394 : vector<8x32xf32>
    %397 = arith.divf %395, %396 : vector<8x32xf32>
    %398 = vector.extract_strided_slice %386 {offsets = [0, 32], sizes = [8, 32], strides = [1, 1]} : vector<8x96xf32> to vector<8x32xf32>
    %399 = vector.extract_strided_slice %389 {offsets = [0, 32], sizes = [8, 32], strides = [1, 1]} : vector<8x96xf32> to vector<8x32xf32>
    %400 = arith.addf %398, %399 : vector<8x32xf32>
    %401 = arith.negf %400 : vector<8x32xf32>
    %402 = math.exp %401 : vector<8x32xf32>
    %cst_100 = arith.constant 1.000000e+00 : f32
    %403 = vector.broadcast %cst_100 : f32 to vector<8x32xf32>
    %404 = arith.addf %403, %402 : vector<8x32xf32>
    %405 = arith.divf %403, %404 : vector<8x32xf32>
    %406 = vector.extract_strided_slice %386 {offsets = [0, 64], sizes = [8, 32], strides = [1, 1]} : vector<8x96xf32> to vector<8x32xf32>
    %407 = vector.extract_strided_slice %389 {offsets = [0, 64], sizes = [8, 32], strides = [1, 1]} : vector<8x96xf32> to vector<8x32xf32>
    %408 = arith.mulf %397, %407 : vector<8x32xf32>
    %409 = arith.addf %406, %408 : vector<8x32xf32>
    %410 = math.tanh %409 : vector<8x32xf32>
    %411 = arith.subf %380, %410 : vector<8x32xf32>
    %412 = arith.mulf %405, %411 : vector<8x32xf32>
    %413 = arith.addf %410, %412 : vector<8x32xf32>
    %414 = arith.index_cast %384 : i32 to index
    %c0_101 = arith.constant 0 : index
    %415 = vector.load %arg16[%414, %c0_101] : memref<64x32xf32, #tpu.memory_space<vmem>>, vector<8x32xf32>
    tpu.vector_store %arg16[%414, %c0_101], %413 {strides = array<i32>} : memref<64x32xf32, #tpu.memory_space<vmem>>, vector<8x32xf32>,
    %c4_i32_102 = arith.constant 4 : i32
    %c8_i32_103 = arith.constant 8 : i32
    %416 = arith.muli %c4_i32_102, %c8_i32_103 : i32
    %417 = tpu.assume_multiple %416, 8 : i32
    %418 = arith.index_cast %417 : i32 to index
    %c0_104 = arith.constant 0 : index
    %419 = vector.load %arg15[%418, %c0_104] : memref<64x96xf32, #tpu.memory_space<vmem>>, vector<8x96xf32>
    %cst_105 = arith.constant dense<0.000000e+00> : vector<8x96xf32>
    %420 = tpu.matmul %413, %281, %cst_105 {dimension_numbers = #tpu.dot_dimension_numbers<[1], [0], [0], [1], [0, 0, 1, 1], [], []>} : vector<8x32xf32>, vector<32x96xf32>, vector<8x96xf32> -> vector<8x96xf32>
    %421 = vector.broadcast %282 : vector<1x96xf32> to vector<8x96xf32>
    %422 = arith.addf %420, %421 : vector<8x96xf32>
    %423 = vector.extract_strided_slice %419 {offsets = [0, 0], sizes = [8, 32], strides = [1, 1]} : vector<8x96xf32> to vector<8x32xf32>
    %424 = vector.extract_strided_slice %422 {offsets = [0, 0], sizes = [8, 32], strides = [1, 1]} : vector<8x96xf32> to vector<8x32xf32>
    %425 = arith.addf %423, %424 : vector<8x32xf32>
    %426 = arith.negf %425 : vector<8x32xf32>
    %427 = math.exp %426 : vector<8x32xf32>
    %cst_106 = arith.constant 1.000000e+00 : f32
    %428 = vector.broadcast %cst_106 : f32 to vector<8x32xf32>
    %429 = arith.addf %428, %427 : vector<8x32xf32>
    %430 = arith.divf %428, %429 : vector<8x32xf32>
    %431 = vector.extract_strided_slice %419 {offsets = [0, 32], sizes = [8, 32], strides = [1, 1]} : vector<8x96xf32> to vector<8x32xf32>
    %432 = vector.extract_strided_slice %422 {offsets = [0, 32], sizes = [8, 32], strides = [1, 1]} : vector<8x96xf32> to vector<8x32xf32>
    %433 = arith.addf %431, %432 : vector<8x32xf32>
    %434 = arith.negf %433 : vector<8x32xf32>
    %435 = math.exp %434 : vector<8x32xf32>
    %cst_107 = arith.constant 1.000000e+00 : f32
    %436 = vector.broadcast %cst_107 : f32 to vector<8x32xf32>
    %437 = arith.addf %436, %435 : vector<8x32xf32>
    %438 = arith.divf %436, %437 : vector<8x32xf32>
    %439 = vector.extract_strided_slice %419 {offsets = [0, 64], sizes = [8, 32], strides = [1, 1]} : vector<8x96xf32> to vector<8x32xf32>
    %440 = vector.extract_strided_slice %422 {offsets = [0, 64], sizes = [8, 32], strides = [1, 1]} : vector<8x96xf32> to vector<8x32xf32>
    %441 = arith.mulf %430, %440 : vector<8x32xf32>
    %442 = arith.addf %439, %441 : vector<8x32xf32>
    %443 = math.tanh %442 : vector<8x32xf32>
    %444 = arith.subf %413, %443 : vector<8x32xf32>
    %445 = arith.mulf %438, %444 : vector<8x32xf32>
    %446 = arith.addf %443, %445 : vector<8x32xf32>
    %447 = arith.index_cast %417 : i32 to index
    %c0_108 = arith.constant 0 : index
    %448 = vector.load %arg16[%447, %c0_108] : memref<64x32xf32, #tpu.memory_space<vmem>>, vector<8x32xf32>
    tpu.vector_store %arg16[%447, %c0_108], %446 {strides = array<i32>} : memref<64x32xf32, #tpu.memory_space<vmem>>, vector<8x32xf32>,
    %c5_i32_109 = arith.constant 5 : i32
    %c8_i32_110 = arith.constant 8 : i32
    %449 = arith.muli %c5_i32_109, %c8_i32_110 : i32
    %450 = tpu.assume_multiple %449, 8 : i32
    %451 = arith.index_cast %450 : i32 to index
    %c0_111 = arith.constant 0 : index
    %452 = vector.load %arg15[%451, %c0_111] : memref<64x96xf32, #tpu.memory_space<vmem>>, vector<8x96xf32>
    %cst_112 = arith.constant dense<0.000000e+00> : vector<8x96xf32>
    %453 = tpu.matmul %446, %281, %cst_112 {dimension_numbers = #tpu.dot_dimension_numbers<[1], [0], [0], [1], [0, 0, 1, 1], [], []>} : vector<8x32xf32>, vector<32x96xf32>, vector<8x96xf32> -> vector<8x96xf32>
    %454 = vector.broadcast %282 : vector<1x96xf32> to vector<8x96xf32>
    %455 = arith.addf %453, %454 : vector<8x96xf32>
    %456 = vector.extract_strided_slice %452 {offsets = [0, 0], sizes = [8, 32], strides = [1, 1]} : vector<8x96xf32> to vector<8x32xf32>
    %457 = vector.extract_strided_slice %455 {offsets = [0, 0], sizes = [8, 32], strides = [1, 1]} : vector<8x96xf32> to vector<8x32xf32>
    %458 = arith.addf %456, %457 : vector<8x32xf32>
    %459 = arith.negf %458 : vector<8x32xf32>
    %460 = math.exp %459 : vector<8x32xf32>
    %cst_113 = arith.constant 1.000000e+00 : f32
    %461 = vector.broadcast %cst_113 : f32 to vector<8x32xf32>
    %462 = arith.addf %461, %460 : vector<8x32xf32>
    %463 = arith.divf %461, %462 : vector<8x32xf32>
    %464 = vector.extract_strided_slice %452 {offsets = [0, 32], sizes = [8, 32], strides = [1, 1]} : vector<8x96xf32> to vector<8x32xf32>
    %465 = vector.extract_strided_slice %455 {offsets = [0, 32], sizes = [8, 32], strides = [1, 1]} : vector<8x96xf32> to vector<8x32xf32>
    %466 = arith.addf %464, %465 : vector<8x32xf32>
    %467 = arith.negf %466 : vector<8x32xf32>
    %468 = math.exp %467 : vector<8x32xf32>
    %cst_114 = arith.constant 1.000000e+00 : f32
    %469 = vector.broadcast %cst_114 : f32 to vector<8x32xf32>
    %470 = arith.addf %469, %468 : vector<8x32xf32>
    %471 = arith.divf %469, %470 : vector<8x32xf32>
    %472 = vector.extract_strided_slice %452 {offsets = [0, 64], sizes = [8, 32], strides = [1, 1]} : vector<8x96xf32> to vector<8x32xf32>
    %473 = vector.extract_strided_slice %455 {offsets = [0, 64], sizes = [8, 32], strides = [1, 1]} : vector<8x96xf32> to vector<8x32xf32>
    %474 = arith.mulf %463, %473 : vector<8x32xf32>
    %475 = arith.addf %472, %474 : vector<8x32xf32>
    %476 = math.tanh %475 : vector<8x32xf32>
    %477 = arith.subf %446, %476 : vector<8x32xf32>
    %478 = arith.mulf %471, %477 : vector<8x32xf32>
    %479 = arith.addf %476, %478 : vector<8x32xf32>
    %480 = arith.index_cast %450 : i32 to index
    %c0_115 = arith.constant 0 : index
    %481 = vector.load %arg16[%480, %c0_115] : memref<64x32xf32, #tpu.memory_space<vmem>>, vector<8x32xf32>
    tpu.vector_store %arg16[%480, %c0_115], %479 {strides = array<i32>} : memref<64x32xf32, #tpu.memory_space<vmem>>, vector<8x32xf32>,
    %c6_i32_116 = arith.constant 6 : i32
    %c8_i32_117 = arith.constant 8 : i32
    %482 = arith.muli %c6_i32_116, %c8_i32_117 : i32
    %483 = tpu.assume_multiple %482, 8 : i32
    %484 = arith.index_cast %483 : i32 to index
    %c0_118 = arith.constant 0 : index
    %485 = vector.load %arg15[%484, %c0_118] : memref<64x96xf32, #tpu.memory_space<vmem>>, vector<8x96xf32>
    %cst_119 = arith.constant dense<0.000000e+00> : vector<8x96xf32>
    %486 = tpu.matmul %479, %281, %cst_119 {dimension_numbers = #tpu.dot_dimension_numbers<[1], [0], [0], [1], [0, 0, 1, 1], [], []>} : vector<8x32xf32>, vector<32x96xf32>, vector<8x96xf32> -> vector<8x96xf32>
    %487 = vector.broadcast %282 : vector<1x96xf32> to vector<8x96xf32>
    %488 = arith.addf %486, %487 : vector<8x96xf32>
    %489 = vector.extract_strided_slice %485 {offsets = [0, 0], sizes = [8, 32], strides = [1, 1]} : vector<8x96xf32> to vector<8x32xf32>
    %490 = vector.extract_strided_slice %488 {offsets = [0, 0], sizes = [8, 32], strides = [1, 1]} : vector<8x96xf32> to vector<8x32xf32>
    %491 = arith.addf %489, %490 : vector<8x32xf32>
    %492 = arith.negf %491 : vector<8x32xf32>
    %493 = math.exp %492 : vector<8x32xf32>
    %cst_120 = arith.constant 1.000000e+00 : f32
    %494 = vector.broadcast %cst_120 : f32 to vector<8x32xf32>
    %495 = arith.addf %494, %493 : vector<8x32xf32>
    %496 = arith.divf %494, %495 : vector<8x32xf32>
    %497 = vector.extract_strided_slice %485 {offsets = [0, 32], sizes = [8, 32], strides = [1, 1]} : vector<8x96xf32> to vector<8x32xf32>
    %498 = vector.extract_strided_slice %488 {offsets = [0, 32], sizes = [8, 32], strides = [1, 1]} : vector<8x96xf32> to vector<8x32xf32>
    %499 = arith.addf %497, %498 : vector<8x32xf32>
    %500 = arith.negf %499 : vector<8x32xf32>
    %501 = math.exp %500 : vector<8x32xf32>
    %cst_121 = arith.constant 1.000000e+00 : f32
    %502 = vector.broadcast %cst_121 : f32 to vector<8x32xf32>
    %503 = arith.addf %502, %501 : vector<8x32xf32>
    %504 = arith.divf %502, %503 : vector<8x32xf32>
    %505 = vector.extract_strided_slice %485 {offsets = [0, 64], sizes = [8, 32], strides = [1, 1]} : vector<8x96xf32> to vector<8x32xf32>
    %506 = vector.extract_strided_slice %488 {offsets = [0, 64], sizes = [8, 32], strides = [1, 1]} : vector<8x96xf32> to vector<8x32xf32>
    %507 = arith.mulf %496, %506 : vector<8x32xf32>
    %508 = arith.addf %505, %507 : vector<8x32xf32>
    %509 = math.tanh %508 : vector<8x32xf32>
    %510 = arith.subf %479, %509 : vector<8x32xf32>
    %511 = arith.mulf %504, %510 : vector<8x32xf32>
    %512 = arith.addf %509, %511 : vector<8x32xf32>
    %513 = arith.index_cast %483 : i32 to index
    %c0_122 = arith.constant 0 : index
    %514 = vector.load %arg16[%513, %c0_122] : memref<64x32xf32, #tpu.memory_space<vmem>>, vector<8x32xf32>
    tpu.vector_store %arg16[%513, %c0_122], %512 {strides = array<i32>} : memref<64x32xf32, #tpu.memory_space<vmem>>, vector<8x32xf32>,
    %c7_i32_123 = arith.constant 7 : i32
    %c8_i32_124 = arith.constant 8 : i32
    %515 = arith.muli %c7_i32_123, %c8_i32_124 : i32
    %516 = tpu.assume_multiple %515, 8 : i32
    %517 = arith.index_cast %516 : i32 to index
    %c0_125 = arith.constant 0 : index
    %518 = vector.load %arg15[%517, %c0_125] : memref<64x96xf32, #tpu.memory_space<vmem>>, vector<8x96xf32>
    %cst_126 = arith.constant dense<0.000000e+00> : vector<8x96xf32>
    %519 = tpu.matmul %512, %281, %cst_126 {dimension_numbers = #tpu.dot_dimension_numbers<[1], [0], [0], [1], [0, 0, 1, 1], [], []>} : vector<8x32xf32>, vector<32x96xf32>, vector<8x96xf32> -> vector<8x96xf32>
    %520 = vector.broadcast %282 : vector<1x96xf32> to vector<8x96xf32>
    %521 = arith.addf %519, %520 : vector<8x96xf32>
    %522 = vector.extract_strided_slice %518 {offsets = [0, 0], sizes = [8, 32], strides = [1, 1]} : vector<8x96xf32> to vector<8x32xf32>
    %523 = vector.extract_strided_slice %521 {offsets = [0, 0], sizes = [8, 32], strides = [1, 1]} : vector<8x96xf32> to vector<8x32xf32>
    %524 = arith.addf %522, %523 : vector<8x32xf32>
    %525 = arith.negf %524 : vector<8x32xf32>
    %526 = math.exp %525 : vector<8x32xf32>
    %cst_127 = arith.constant 1.000000e+00 : f32
    %527 = vector.broadcast %cst_127 : f32 to vector<8x32xf32>
    %528 = arith.addf %527, %526 : vector<8x32xf32>
    %529 = arith.divf %527, %528 : vector<8x32xf32>
    %530 = vector.extract_strided_slice %518 {offsets = [0, 32], sizes = [8, 32], strides = [1, 1]} : vector<8x96xf32> to vector<8x32xf32>
    %531 = vector.extract_strided_slice %521 {offsets = [0, 32], sizes = [8, 32], strides = [1, 1]} : vector<8x96xf32> to vector<8x32xf32>
    %532 = arith.addf %530, %531 : vector<8x32xf32>
    %533 = arith.negf %532 : vector<8x32xf32>
    %534 = math.exp %533 : vector<8x32xf32>
    %cst_128 = arith.constant 1.000000e+00 : f32
    %535 = vector.broadcast %cst_128 : f32 to vector<8x32xf32>
    %536 = arith.addf %535, %534 : vector<8x32xf32>
    %537 = arith.divf %535, %536 : vector<8x32xf32>
    %538 = vector.extract_strided_slice %518 {offsets = [0, 64], sizes = [8, 32], strides = [1, 1]} : vector<8x96xf32> to vector<8x32xf32>
    %539 = vector.extract_strided_slice %521 {offsets = [0, 64], sizes = [8, 32], strides = [1, 1]} : vector<8x96xf32> to vector<8x32xf32>
    %540 = arith.mulf %529, %539 : vector<8x32xf32>
    %541 = arith.addf %538, %540 : vector<8x32xf32>
    %542 = math.tanh %541 : vector<8x32xf32>
    %543 = arith.subf %512, %542 : vector<8x32xf32>
    %544 = arith.mulf %537, %543 : vector<8x32xf32>
    %545 = arith.addf %542, %544 : vector<8x32xf32>
    %546 = arith.index_cast %516 : i32 to index
    %c0_129 = arith.constant 0 : index
    %547 = vector.load %arg16[%546, %c0_129] : memref<64x32xf32, #tpu.memory_space<vmem>>, vector<8x32xf32>
    tpu.vector_store %arg16[%546, %c0_129], %545 {strides = array<i32>} : memref<64x32xf32, #tpu.memory_space<vmem>>, vector<8x32xf32>,
    %c8_i32_130 = arith.constant 8 : i32
    %c0_131 = arith.constant 0 : index
    %c0_132 = arith.constant 0 : index
    %548 = vector.load %arg16[%c0_131, %c0_132] : memref<64x32xf32, #tpu.memory_space<vmem>>, vector<64x32xf32>
    %c0_133 = arith.constant 0 : index
    %c0_134 = arith.constant 0 : index
    %549 = vector.load %arg10[%c0_133, %c0_134] : memref<32x24xf32, #tpu.memory_space<vmem>>, vector<32x24xf32>
    %cst_135 = arith.constant dense<0.000000e+00> : vector<64x24xf32>
    %550 = tpu.matmul %548, %549, %cst_135 {dimension_numbers = #tpu.dot_dimension_numbers<[1], [0], [0], [1], [0, 0, 1, 1], [], []>} : vector<64x32xf32>, vector<32x24xf32>, vector<64x24xf32> -> vector<64x24xf32>
    %c0_136 = arith.constant 0 : index
    %c0_137 = arith.constant 0 : index
    %551 = vector.load %arg11[%c0_136, %c0_137] : memref<1x24xf32, #tpu.memory_space<vmem>>, vector<1x24xf32>
    %552 = vector.broadcast %551 : vector<1x24xf32> to vector<64x24xf32>
    %553 = arith.addf %550, %552 : vector<64x24xf32>
    %c0_138 = arith.constant 0 : index
    %c0_139 = arith.constant 0 : index
    %554 = vector.load %arg12[%c0_138, %c0_139] : memref<24x24xf32, #tpu.memory_space<vmem>>, vector<24x24xf32>
    %cst_140 = arith.constant dense<0.000000e+00> : vector<64x24xf32>
    %555 = tpu.matmul %553, %554, %cst_140 {dimension_numbers = #tpu.dot_dimension_numbers<[1], [0], [0], [1], [0, 0, 1, 1], [], []>} : vector<64x24xf32>, vector<24x24xf32>, vector<64x24xf32> -> vector<64x24xf32>
    %c0_141 = arith.constant 0 : index
    %c0_142 = arith.constant 0 : index
    %556 = vector.load %arg13[%c0_141, %c0_142] : memref<1x24xf32, #tpu.memory_space<vmem>>, vector<1x24xf32>
    %557 = vector.broadcast %556 : vector<1x24xf32> to vector<64x24xf32>
    %558 = arith.addf %555, %557 : vector<64x24xf32>
    %559 = tpu.concatenate %558, %548 in 1 : vector<64x24xf32>, vector<64x32xf32> -> vector<64x56xf32>
    %c0_143 = arith.constant 0 : index
    %c0_144 = arith.constant 0 : index
    %560 = vector.load %arg14[%c0_143, %c0_144] : memref<64x56xf32, #tpu.memory_space<vmem>>, vector<64x56xf32>
    tpu.vector_store %arg14[%c0_143, %c0_144], %559 {strides = array<i32>} : memref<64x56xf32, #tpu.memory_space<vmem>>, vector<64x56xf32>,
    return
  }
  func.func @transform_0(%arg0: i32) -> (i32, i32) {
    %c0_i32 = arith.constant 0 : i32
    %c0_i32_0 = arith.constant 0 : i32
    %c0_i32_1 = arith.constant 0 : i32
    return %c0_i32, %c0_i32_0 : i32, i32
  }
  func.func @transform_1(%arg0: i32) -> (i32, i32) {
    %c0_i32 = arith.constant 0 : i32
    %c0_i32_0 = arith.constant 0 : i32
    %c0_i32_1 = arith.constant 0 : i32
    return %c0_i32, %c0_i32_0 : i32, i32
  }
  func.func @transform_2(%arg0: i32) -> (i32, i32) {
    %c0_i32 = arith.constant 0 : i32
    %c0_i32_0 = arith.constant 0 : i32
    %c0_i32_1 = arith.constant 0 : i32
    return %c0_i32, %c0_i32_0 : i32, i32
  }
  func.func @transform_3(%arg0: i32) -> (i32, i32) {
    %c0_i32 = arith.constant 0 : i32
    %c0_i32_0 = arith.constant 0 : i32
    %c0_i32_1 = arith.constant 0 : i32
    return %c0_i32, %c0_i32_0 : i32, i32
  }
  func.func @transform_4(%arg0: i32) -> (i32, i32) {
    %c0_i32 = arith.constant 0 : i32
    %c0_i32_0 = arith.constant 0 : i32
    %c0_i32_1 = arith.constant 0 : i32
    return %c0_i32, %c0_i32_0 : i32, i32
  }
  func.func @transform_5(%arg0: i32) -> (i32, i32) {
    %c0_i32 = arith.constant 0 : i32
    %c0_i32_0 = arith.constant 0 : i32
    %c0_i32_1 = arith.constant 0 : i32
    return %c0_i32, %c0_i32_0 : i32, i32
  }
  func.func @transform_6(%arg0: i32) -> (i32, i32) {
    %c0_i32 = arith.constant 0 : i32
    %c0_i32_0 = arith.constant 0 : i32
    %c0_i32_1 = arith.constant 0 : i32
    return %c0_i32, %c0_i32_0 : i32, i32
  }
  func.func @transform_7(%arg0: i32) -> (i32, i32) {
    %c0_i32 = arith.constant 0 : i32
    %c0_i32_0 = arith.constant 0 : i32
    %c0_i32_1 = arith.constant 0 : i32
    return %c0_i32, %c0_i32_0 : i32, i32
  }
  func.func @transform_8(%arg0: i32) -> (i32, i32) {
    %c0_i32 = arith.constant 0 : i32
    %c0_i32_0 = arith.constant 0 : i32
    %c0_i32_1 = arith.constant 0 : i32
    return %c0_i32, %c0_i32_0 : i32, i32
  }
  func.func @transform_9(%arg0: i32) -> (i32, i32) {
    %c0_i32 = arith.constant 0 : i32
    %c0_i32_0 = arith.constant 0 : i32
    %c0_i32_1 = arith.constant 0 : i32
    return %c0_i32, %c0_i32_0 : i32, i32
  }
  func.func @transform_10(%arg0: i32) -> (i32, i32) {
    %c0_i32 = arith.constant 0 : i32
    %c0_i32_0 = arith.constant 0 : i32
    %c0_i32_1 = arith.constant 0 : i32
    return %c0_i32, %c0_i32_0 : i32, i32
  }
  func.func @transform_11(%arg0: i32) -> (i32, i32) {
    %c0_i32 = arith.constant 0 : i32
    %c0_i32_0 = arith.constant 0 : i32
    %c0_i32_1 = arith.constant 0 : i32
    return %c0_i32, %c0_i32_0 : i32, i32
  }
  func.func @transform_12(%arg0: i32) -> (i32, i32) {
    %c0_i32 = arith.constant 0 : i32
    %c0_i32_0 = arith.constant 0 : i32
    %c0_i32_1 = arith.constant 0 : i32
    return %c0_i32, %c0_i32_0 : i32, i32
  }
  func.func @transform_13(%arg0: i32) -> (i32, i32) {
    %c0_i32 = arith.constant 0 : i32
    %c0_i32_0 = arith.constant 0 : i32
    %c0_i32_1 = arith.constant 0 : i32
    return %c0_i32, %c0_i32_0 : i32, i32
  }
}

</mosaic_0001>

<bundles_post_ra>
// kernel: tpu_custom_call.1
= control target key start
LH: loop header
LB: loop body
LE: loop exit
PB: predicated region body
PF: predicated region fallthrough
CT: control target
= control target key end

     0   :  { %vm61_vm0 = vcmask 130048   ;;  %v3103_v0 = vmov 0.0|0.0   ;;  %vm3104_vm1 = vmmov 0   ;;  %v3105_v4 = vmov 0.0   ;;  %s3108_s26 = smov 32   ;;  %s3679_s1 = inlined_call_operand.vmem [shape: f32[16,96], index: 1, kind: input, shape index: {}]   ;;  %s3680_s2 = inlined_call_operand.vmem [shape: f32[32,96], index: 2, kind: input, shape index: {}]   ;;  %s3681_s0 = inlined_call_operand.vmem [shape: f32[64,16], index: 0, kind: input, shape index: {}]   ;;  %s3682_s3 = inlined_call_operand.vmem [shape: f32[1,96], index: 3, kind: input, shape index: {}]   ;;  %s3683_s4 = inlined_call_operand.vmem [shape: f32[1,96], index: 4, kind: input, shape index: {}]   ;;  %s3684_s5 = inlined_call_operand.vmem [shape: f32[32,96], index: 5, kind: input, shape index: {}]   ;;  %s3685_s7 = inlined_call_operand.vmem [shape: f32[1,96], index: 7, kind: input, shape index: {}]   ;;  %s3686_s6 = inlined_call_operand.vmem [shape: f32[32,96], index: 6, kind: input, shape index: {}]   ;;  %s3687_s8 = inlined_call_operand.vmem [shape: f32[1,96], index: 8, kind: input, shape index: {}]   ;;  %s3688_s9 = inlined_call_operand.vmem [shape: f32[32,24], index: 9, kind: input, shape index: {}]   ;;  %s3689_s11 = inlined_call_operand.vmem [shape: f32[24,24], index: 11, kind: input, shape index: {}]   ;;  %s3690_s10 = inlined_call_operand.vmem [shape: f32[1,24], index: 10, kind: input, shape index: {}]   ;;  %s3691_s12 = inlined_call_operand.vmem [shape: f32[1,24], index: 12, kind: input, shape index: {}]   ;;  %s3692_s13 = inlined_call_operand.vmem [shape: f32[64,56], index: 13, kind: output, shape index: {}]  }
   0x1   :  { %2884 = vmatprep.subr.bf16.mxu1 %v3103_v0  ;;  %v52_v1 = vld [vmem:[%s3679_s1] sm:$0xff]  ;;  %v53_v2 = vld [vmem:[%s3679_s1 + $0x8] sm:$0xff]  ;;  %2654 = vmatprep.mubr.msk.f32.mxu1 %vm3104_vm1, %v3105_v4  ;;  %v202_v9 = vld [vmem:[%s3680_s2 + $0x10] sm:$0xff]  ;;  %vm191_vm2 = vcmask 785408   ;;  %vm212_vm3 = vcmask 261120   ;;  %vm2262_vm4 = vcmask 195584  }
   0x2   :  { %v200_v3 = vld [vmem:[%s3680_s2] sm:$0xff]  ;;  %v2880_v5 = vpack.c.bf16 %v53_v2, %v52_v1  ;;  %v201_v6 = vld [vmem:[%s3680_s2 + $0x8] sm:$0xff]  ;;  %v203_v10 = vld [vmem:[%s3680_s2 + $0x18] sm:$0xff]  ;;  %vm2424_vm5 = vcmask 457728  }
   0x3   :  { %v44_v7 = vld [vmem:[%s3681_s0] sm:$0xff]  ;;  %v3198_v8 = vpack.c.bf16 %v201_v6, %v200_v3  ;;  %v45_v11 = vld [vmem:[%s3681_s0 + $0x8] sm:$0xff]  ;;  %v3211_v12 = vpack.c.bf16 %v203_v10, %v202_v9  ;;  %v46_v54 = vld [vmem:[%s3681_s0 + $0x10] sm:$0xff] }
   0x4   :  { %2634 = vmatprep.mubr.msk.f32.mxu0 %vm61_vm0, %v44_v7  ;;  %2881 = vmatprep.subr.bf16.mxu0 %v2880_v5  ;;  %v3232_v13 = vld [vmem:[%s3682_s3] ss:$0 sm:$0xff]  ;;  %s3106_s3 = smov 64   ;;  %v47_v55 = vld [vmem:[%s3681_s0 + $0x18] sm:$0xff]  ;;  %v49_v57 = vld [vmem:[%s3681_s0 + $0x28] sm:$0xff] }
   0x5   :  { %2886 = vmatpush3.bf16.msra.mxu1 %v3198_v8  ;;  %2883 = vmatpush3.bf16.msra.mxu0 %v2880_v5  ;;  %v3239_v18 = vld [vmem:[%s3683_s4] ss:$0 sm:$0xff]  ;;  %s3107_s4 = smov 96   ;;  %v50_v58 = vld [vmem:[%s3681_s0 + $0x30] sm:$0xff]  ;;  %v51_v59 = vld [vmem:[%s3681_s0 + $0x38] sm:$0xff] }
   0x6   :  { %2887 = vmatprep.subr.bf16.mxu1 %v3103_v0  ;;  %2896 = vmatprep.subr.bf16.mxu0 %v3103_v0  ;;  %v48_v56 = vld [vmem:[%s3681_s0 + $0x20] sm:$0xff] }
   0x8   :  { %2635 = vmatmul.mubr.msk.f32.vlgmr.msra.gmra.mrb[0].mxu0 %vm61_vm0, %v45_v11 }
   0x9   :  { %2889 = vmatpush3.bf16.msra.mxu1 %v3211_v12  ;;  %2898 = vmatpush3.bf16.msra.mxu0 %v3198_v8 }
   0xa   :  { %2890 = vmatprep.subr.bf16.mxu1 %v3103_v0  ;;  %2899 = vmatprep.subr.bf16.mxu0 %v3103_v0 }
   0xb   :  { %2637 = vmatprep.mubr.msk.f32.mxu0 %vm61_vm0, %v46_v54 }
   0xc   :  { %2655 = vmatmul.mubr.f32.vlgmr.msra.gmra.mrb[0].mxu1 %v3105_v4  ;;  %2638 = vmatmul.mubr.msk.f32.gmra.mrb[2].mxu0 %vm61_vm0, %v47_v55 }
   0xd   :  { %2892 = vmatpush3.bf16.msra.mxu1 %v3198_v8  ;;  %2665 = vmatprep.mubr.msk.f32.mxu1 %vm3104_vm1, %v3105_v4 }
   0xe   :  { %2893 = vmatprep.subr.bf16.mxu1 %v3103_v0  ;;  %2901 = vmatpush3.bf16.msra.mxu0 %v3211_v12 }
   0xf   :  { %2908 = vmatprep.subr.bf16.mxu0 %v3103_v0  ;;  %2640 = vmatprep.mubr.msk.f32.mxu0 %vm61_vm0, %v48_v56 }
  0x10   :  { %2641 = vmatmul.mubr.msk.f32.gmra.mrb[4].mxu0 %vm61_vm0, %v49_v57 }
  0x11   :  { %2895 = vmatpush3.bf16.msra.mxu1 %v3211_v12  ;;  %2643 = vmatprep.mubr.msk.f32.mxu0 %vm61_vm0, %v50_v58 }
  0x12   :  { %2902 = vmatprep.subr.bf16.mxu1 %v3103_v0 }
  0x14   :  { %2644 = vmatmul.mubr.msk.f32.gmra.mrb[6].mxu0 %vm61_vm0, %v51_v59 }
  0x15   :  { %2676 = vmatprep.mubr.msk.f32.mxu0 %vm3104_vm1, %v3105_v4 }
  0xdb   :  { %v2636_v14 = vpop.f32.mrb[0].mxu0 }
  0xdc   :  { %v158_v15 = vadd.f32 %v2636_v14, %v3232_v13  ;;  %v152_v16 = vpop.f32.mrb[1].mxu0 }
  0xdd   :  { %v153_v17 = vadd.f32 %v3232_v13, %v152_v16 }
  0xde   :  { %193 = vst.msk [vmem:[#allocation2 + $0x8] sm:$0xff] %vm191_vm2, %v158_v15 }
  0xdf   :  { %192 = vst.msk [vmem:[#allocation2] sm:$0xff] %vm191_vm2, %v153_v17  ;;  %v282_v19 = vpop.f32.mrb[0].mxu1  ;;  %v2639_v1 = vpop.f32.mrb[2].mxu0 }
  0xe0   :  { %v283_v20 = vadd.f32 %v3239_v18, %v282_v19  ;;  %v2656_v21 = vpop.f32.mrb[1].mxu1  ;;  %v168_v2 = vadd.f32 %v2639_v1, %v3232_v13  ;;  %v162_v3 = vpop.f32.mrb[3].mxu0 }
  0xe1   :  { %v163_v5 = vadd.f32 %v3232_v13, %v162_v3 }
  0xe2   :  { %294 = vrot.lane.b32.xlu0 %v283_v20, %s3106_s3  ;;  %195 = vst.msk [vmem:[#allocation2 + $0x18] sm:$0xff] %vm191_vm2, %v168_v2 }
  0xe3   :  { %194 = vst.msk [vmem:[#allocation2 + $0x10] sm:$0xff] %vm191_vm2, %v163_v5  ;;  %v2642_v6 = vpop.f32.mrb[4].mxu0 }
  0xe4   :  { %v178_v7 = vadd.f32 %v2642_v6, %v3232_v13  ;;  %v172_v9 = vpop.f32.mrb[5].mxu0 }
  0xe5   :  { %v321_v42 = vld [vmem:[#allocation2 + $0x8] sm:$0xff]  ;;  %v173_v10 = vadd.f32 %v3232_v13, %v172_v9 }
  0xe6   :  { %v205_v22 = vld [vmem:[#allocation2] sm:$0xff]  ;;  %197 = vst.msk [vmem:[#allocation2 + $0x28] sm:$0xff] %vm191_vm2, %v178_v7 }
  0xe7   :  { %v286_v23 = vadd.f32 %v283_v20, %v205_v22  ;;  %196 = vst.msk [vmem:[#allocation2 + $0x20] sm:$0xff] %vm191_vm2, %v173_v10  ;;  %v2645_v11 = vpop.f32.mrb[6].mxu0 }
  0xe8   :  { %v188_v14 = vadd.f32 %v2645_v11, %v3232_v13  ;;  %v182_v15 = vpop.f32.mrb[7].mxu0 }
  0xe9   :  { %v2447_v24 = vmul.f32 -1.442695, %v286_v23  ;;  %v183_v16 = vadd.f32 %v3232_v13, %v182_v15 }
  0xea   :  { %199 = vst.msk [vmem:[#allocation2 + $0x38] sm:$0xff] %vm191_vm2, %v188_v14  ;;  %v430_v21 = vld [vmem:[#allocation2 + $0x10] sm:$0xff] }
  0xeb   :  { %3007 = vpow2.f32 %v2447_v24  ;;  %198 = vst.msk [vmem:[#allocation2 + $0x30] sm:$0xff] %vm191_vm2, %v183_v16 }
  0xf5   :  { %v3008_v25 = vpop.eup %3007 }
  0xf6   :  { %v290_v26 = vadd.f32 1.0, %v3008_v25 }
  0xf8   :  { %3009 = vrcp.f32 %v290_v26 }
 0x102   :  { %v3010_v27 = vpop.eup %3009 }
 0x154   :  { %v295_v28 = vpop.permute.xlu0 %294 }
 0x155   :  { %v297_v29 = vmul.f32 %v3010_v27, %v295_v28 }
 0x157   :  { %299 = vrot.lane.b32.xlu0 %v297_v29, %s3106_s3 }
 0x1c9   :  { %v300_v30 = vpop.permute.xlu0 %299 }
 0x1ca   :  { %v302_v31 = vadd.f32 %v300_v30, %v205_v22 }
 0x1cc   :  { %3011 = vtanh.f32 %v302_v31 }
 0x1d6   :  { %v3012_v32 = vpop.eup %3011 }
 0x1d7   :  { %v304_v33 = vsub.f32 0.0, %v3012_v32 }
 0x1d9   :  { %306 = vrot.lane.b32.xlu1 %v304_v33, %s3107_s4 }
 0x24b   :  { %v307_v34 = vpop.permute.xlu1 %306 }
 0x24c   :  { %v309_v35 = vmul.f32 %v3010_v27, %v307_v34 }
 0x24e   :  { %311 = vrot.lane.b32.xlu1 %v309_v35, %s3108_s26 }
 0x2c0   :  { %v312_v36 = vpop.permute.xlu1 %311 }
 0x2c1   :  { %v314_v37 = vadd.f32 %v3012_v32, %v312_v36 }
 0x2c3   :  { %316 = vrot.lane.b32.xlu0 %v314_v37, %s3106_s3 }
 0x335   :  { %v317_v38 = vpop.permute.xlu0 %316 }
 0x336   :  { %319 = vst.msk [vmem:[#allocation3] sm:$0xff] %vm212_vm3, %v317_v38  ;;  %2666 = vmatmul.mubr.msk.f32.vlgmr.msra.gmra.mrb[2].mxu1 %vm212_vm3, %v317_v38 }
 0x337   :  { %2904 = vmatpush3.bf16.msra.mxu1 %v3198_v8  ;;  %2687 = vmatprep.mubr.msk.f32.mxu1 %vm3104_vm1, %v3105_v4 }
 0x338   :  { %2905 = vmatprep.subr.bf16.mxu1 %v3103_v0 }
 0x33b   :  { %2907 = vmatpush3.bf16.msra.mxu1 %v3211_v12 }
 0x33c   :  { %2914 = vmatprep.subr.bf16.mxu1 %v3103_v0 }
 0x409   :  { %v390_v39 = vpop.f32.mrb[2].mxu1 }
 0x40a   :  { %v391_v40 = vadd.f32 %v3239_v18, %v390_v39  ;;  %v2667_v41 = vpop.f32.mrb[3].mxu1 }
 0x40b   :  { %v539_v41 = vld [vmem:[#allocation2 + $0x18] sm:$0xff] }
 0x40c   :  { %402 = vrot.lane.b32.xlu1 %v391_v40, %s3106_s3  ;;  %v394_v43 = vadd.f32 %v391_v40, %v321_v42 }
 0x40e   :  { %v2449_v44 = vmul.f32 -1.442695, %v394_v43 }
 0x410   :  { %3013 = vpow2.f32 %v2449_v44 }
 0x41a   :  { %v3014_v45 = vpop.eup %3013 }
 0x41b   :  { %v398_v46 = vadd.f32 1.0, %v3014_v45 }
 0x41d   :  { %3015 = vrcp.f32 %v398_v46 }
 0x427   :  { %v3016_v47 = vpop.eup %3015 }
 0x47e   :  { %v403_v48 = vpop.permute.xlu1 %402 }
 0x47f   :  { %v405_v49 = vmul.f32 %v3016_v47, %v403_v48 }
 0x481   :  { %407 = vrot.lane.b32.xlu0 %v405_v49, %s3106_s3 }
 0x4f3   :  { %v408_v50 = vpop.permute.xlu0 %407 }
 0x4f4   :  { %v410_v51 = vadd.f32 %v408_v50, %v321_v42 }
 0x4f6   :  { %3017 = vtanh.f32 %v410_v51 }
 0x500   :  { %v3018_v52 = vpop.eup %3017 }
 0x501   :  { %v412_v53 = vsub.f32 %v314_v37, %v3018_v52 }
 0x503   :  { %414 = vrot.lane.b32.xlu1 %v412_v53, %s3107_s4 }
 0x575   :  { %v415_v60 = vpop.permute.xlu1 %414 }
 0x576   :  { %v417_v61 = vmul.f32 %v3016_v47, %v415_v60 }
 0x578   :  { %419 = vrot.lane.b32.xlu0 %v417_v61, %s3108_s26  ;;  %v648_v61 = vld [vmem:[#allocation2 + $0x20] sm:$0xff] }
 0x5ea   :  { %v420_v62 = vpop.permute.xlu0 %419 }
 0x5eb   :  { %v422_v63 = vadd.f32 %v3018_v52, %v420_v62 }
 0x5ed   :  { %424 = vrot.lane.b32.xlu1 %v422_v63, %s3106_s3 }
 0x65f   :  { %v425_v17 = vpop.permute.xlu1 %424 }
 0x660   :  { %428 = vst.msk [vmem:[#allocation3 + $0x8] sm:$0xff] %vm212_vm3, %v425_v17  ;;  %2677 = vmatmul.mubr.msk.f32.vlgmr.msra.gmra.mrb[8].mxu0 %vm212_vm3, %v425_v17 }
 0x661   :  { %2910 = vmatpush3.bf16.msra.mxu0 %v3198_v8  ;;  %2698 = vmatprep.mubr.msk.f32.mxu0 %vm3104_vm1, %v3105_v4 }
 0x662   :  { %2911 = vmatprep.subr.bf16.mxu0 %v3103_v0 }
 0x665   :  { %2913 = vmatpush3.bf16.msra.mxu0 %v3211_v12 }
 0x666   :  { %2920 = vmatprep.subr.bf16.mxu0 %v3103_v0 }
 0x733   :  { %v499_v13 = vpop.f32.mrb[8].mxu0 }
 0x734   :  { %v500_v19 = vadd.f32 %v3239_v18, %v499_v13  ;;  %v2678_v20 = vpop.f32.mrb[9].mxu0 }
 0x736   :  { %511 = vrot.lane.b32.xlu0 %v500_v19, %s3106_s3  ;;  %v503_v22 = vadd.f32 %v500_v19, %v430_v21 }
 0x738   :  { %v2451_v23 = vmul.f32 -1.442695, %v503_v22  ;;  %v757_v22 = vld [vmem:[#allocation2 + $0x28] sm:$0xff] }
 0x73a   :  { %3019 = vpow2.f32 %v2451_v23 }
 0x744   :  { %v3020_v24 = vpop.eup %3019 }
 0x745   :  { %v507_v25 = vadd.f32 1.0, %v3020_v24 }
 0x747   :  { %3021 = vrcp.f32 %v507_v25 }
 0x751   :  { %v3022_v26 = vpop.eup %3021 }
 0x7a8   :  { %v512_v27 = vpop.permute.xlu0 %511 }
 0x7a9   :  { %v514_v28 = vmul.f32 %v3022_v26, %v512_v27 }
 0x7ab   :  { %516 = vrot.lane.b32.xlu1 %v514_v28, %s3106_s3 }
 0x81d   :  { %v517_v29 = vpop.permute.xlu1 %516 }
 0x81e   :  { %v519_v30 = vadd.f32 %v517_v29, %v430_v21 }
 0x820   :  { %3023 = vtanh.f32 %v519_v30 }
 0x82a   :  { %v3024_v31 = vpop.eup %3023 }
 0x82b   :  { %v521_v32 = vsub.f32 %v422_v63, %v3024_v31 }
 0x82d   :  { %523 = vrot.lane.b32.xlu0 %v521_v32, %s3107_s4  ;;  %v1091_v32 = vld [vmem:[%s3684_s5] sm:$0xff] }
 0x89f   :  { %v524_v33 = vpop.permute.xlu0 %523 }
 0x8a0   :  { %v526_v34 = vmul.f32 %v3022_v26, %v524_v33  ;;  %v1092_v33 = vld [vmem:[%s3684_s5 + $0x8] sm:$0xff] }
 0x8a2   :  { %528 = vrot.lane.b32.xlu1 %v526_v34, %s3108_s26  ;;  %v2932_v34 = vpack.c.bf16 %v1092_v33, %v1091_v32 }
 0x914   :  { %v529_v35 = vpop.permute.xlu1 %528 }
 0x915   :  { %v531_v36 = vadd.f32 %v3024_v31, %v529_v35 }
 0x917   :  { %533 = vrot.lane.b32.xlu0 %v531_v36, %s3106_s3 }
 0x989   :  { %v534_v37 = vpop.permute.xlu0 %533 }
 0x98a   :  { %537 = vst.msk [vmem:[#allocation3 + $0x10] sm:$0xff] %vm212_vm3, %v534_v37  ;;  %2688 = vmatmul.mubr.msk.f32.vlgmr.msra.gmra.mrb[4].mxu1 %vm212_vm3, %v534_v37 }
 0x98b   :  { %2916 = vmatpush3.bf16.msra.mxu1 %v3198_v8  ;;  %2709 = vmatprep.mubr.msk.f32.mxu1 %vm3104_vm1, %v3105_v4 }
 0x98c   :  { %2917 = vmatprep.subr.bf16.mxu1 %v3103_v0 }
 0x98f   :  { %2919 = vmatpush3.bf16.msra.mxu1 %v3211_v12 }
 0x990   :  { %2926 = vmatprep.subr.bf16.mxu1 %v3103_v0 }
 0xa5d   :  { %v608_v38 = vpop.f32.mrb[4].mxu1 }
 0xa5e   :  { %v609_v39 = vadd.f32 %v3239_v18, %v608_v38  ;;  %v2689_v40 = vpop.f32.mrb[5].mxu1 }
 0xa5f   :  { %v1094_v40 = vld [vmem:[%s3684_s5 + $0x18] sm:$0xff] }
 0xa60   :  { %620 = vrot.lane.b32.xlu1 %v609_v39, %s3106_s3  ;;  %v612_v42 = vadd.f32 %v609_v39, %v539_v41  ;;  %v1093_v39 = vld [vmem:[%s3684_s5 + $0x10] sm:$0xff] }
 0xa62   :  { %v2453_v43 = vmul.f32 -1.442695, %v612_v42 }
 0xa64   :  { %3025 = vpow2.f32 %v2453_v43  ;;  %v1083_v43 = vld [vmem:[#allocation3] sm:$0xff] }
 0xa6e   :  { %v3026_v44 = vpop.eup %3025 }
 0xa6f   :  { %v616_v45 = vadd.f32 1.0, %v3026_v44  ;;  %v1084_v44 = vld [vmem:[#allocation3 + $0x8] sm:$0xff] }
 0xa71   :  { %3027 = vrcp.f32 %v616_v45  ;;  %v1085_v45 = vld [vmem:[#allocation3 + $0x10] sm:$0xff] }
 0xa7b   :  { %v3028_v46 = vpop.eup %3027 }
 0xad2   :  { %v621_v47 = vpop.permute.xlu1 %620 }
 0xad3   :  { %v623_v48 = vmul.f32 %v3028_v46, %v621_v47 }
 0xad5   :  { %625 = vrot.lane.b32.xlu0 %v623_v48, %s3106_s3 }
 0xb47   :  { %v626_v49 = vpop.permute.xlu0 %625 }
 0xb48   :  { %v628_v50 = vadd.f32 %v626_v49, %v539_v41  ;;  %v2936_v41 = vpack.c.bf16 %v1094_v40, %v1093_v39 }
 0xb4a   :  { %3029 = vtanh.f32 %v628_v50 }
 0xb54   :  { %v3030_v51 = vpop.eup %3029 }
 0xb55   :  { %v630_v52 = vsub.f32 %v531_v36, %v3030_v51 }
 0xb57   :  { %632 = vrot.lane.b32.xlu1 %v630_v52, %s3107_s4  ;;  %v3385_v52 = vld [vmem:[%s3685_s7] ss:$0 sm:$0xff] }
 0xbc9   :  { %v633_v53 = vpop.permute.xlu1 %632 }
 0xbca   :  { %v635_v54 = vmul.f32 %v3028_v46, %v633_v53 }
 0xbcc   :  { %637 = vrot.lane.b32.xlu0 %v635_v54, %s3108_s26 }
 0xc3e   :  { %v638_v55 = vpop.permute.xlu0 %637 }
 0xc3f   :  { %v640_v56 = vadd.f32 %v3030_v51, %v638_v55 }
 0xc41   :  { %642 = vrot.lane.b32.xlu1 %v640_v56, %s3106_s3 }
 0xcb3   :  { %v643_v57 = vpop.permute.xlu1 %642 }
 0xcb4   :  { %646 = vst.msk [vmem:[#allocation3 + $0x18] sm:$0xff] %vm212_vm3, %v643_v57  ;;  %2699 = vmatmul.mubr.msk.f32.vlgmr.msra.gmra.mrb[10].mxu0 %vm212_vm3, %v643_v57 }
 0xcb5   :  { %2922 = vmatpush3.bf16.msra.mxu0 %v3198_v8  ;;  %2720 = vmatprep.mubr.msk.f32.mxu0 %vm3104_vm1, %v3105_v4 }
 0xcb6   :  { %2923 = vmatprep.subr.bf16.mxu0 %v3103_v0 }
 0xcb9   :  { %2925 = vmatpush3.bf16.msra.mxu0 %v3211_v12 }
 0xcba   :  { %2933 = vmatprep.subr.bf16.mxu0 %v2932_v34 }
 0xcbb   :  { %v1086_v46 = vld [vmem:[#allocation3 + $0x18] sm:$0xff] }
 0xd87   :  { %v717_v58 = vpop.f32.mrb[10].mxu0 }
 0xd88   :  { %v718_v59 = vadd.f32 %v3239_v18, %v717_v58  ;;  %v2700_v60 = vpop.f32.mrb[11].mxu0 }
 0xd8a   :  { %729 = vrot.lane.b32.xlu0 %v718_v59, %s3106_s3  ;;  %v721_v62 = vadd.f32 %v718_v59, %v648_v61 }
 0xd8c   :  { %v2455_v63 = vmul.f32 -1.442695, %v721_v62 }
 0xd8e   :  { %3031 = vpow2.f32 %v2455_v63 }
 0xd98   :  { %v3032_v1 = vpop.eup %3031 }
 0xd99   :  { %v725_v2 = vadd.f32 1.0, %v3032_v1 }
 0xd9b   :  { %3033 = vrcp.f32 %v725_v2  ;;  %v866_v2 = vld [vmem:[#allocation2 + $0x30] sm:$0xff] }
 0xda5   :  { %v3034_v3 = vpop.eup %3033 }
 0xdfc   :  { %v730_v5 = vpop.permute.xlu0 %729 }
 0xdfd   :  { %v732_v6 = vmul.f32 %v3034_v3, %v730_v5 }
 0xdff   :  { %734 = vrot.lane.b32.xlu1 %v732_v6, %s3106_s3 }
 0xe71   :  { %v735_v7 = vpop.permute.xlu1 %734 }
 0xe72   :  { %v737_v9 = vadd.f32 %v735_v7, %v648_v61 }
 0xe74   :  { %3035 = vtanh.f32 %v737_v9 }
 0xe7e   :  { %v3036_v10 = vpop.eup %3035 }
 0xe7f   :  { %v739_v11 = vsub.f32 %v640_v56, %v3036_v10 }
 0xe81   :  { %741 = vrot.lane.b32.xlu0 %v739_v11, %s3107_s4 }
 0xef3   :  { %v742_v14 = vpop.permute.xlu0 %741 }
 0xef4   :  { %v744_v15 = vmul.f32 %v3034_v3, %v742_v14 }
 0xef6   :  { %746 = vrot.lane.b32.xlu1 %v744_v15, %s3108_s26 }
 0xf68   :  { %v747_v16 = vpop.permute.xlu1 %746 }
 0xf69   :  { %v749_v17 = vadd.f32 %v3036_v10, %v747_v16 }
 0xf6b   :  { %751 = vrot.lane.b32.xlu0 %v749_v17, %s3106_s3 }
 0xfdd   :  { %v752_v13 = vpop.permute.xlu0 %751 }
 0xfde   :  { %755 = vst.msk [vmem:[#allocation3 + $0x20] sm:$0xff] %vm212_vm3, %v752_v13  ;;  %2710 = vmatmul.mubr.msk.f32.vlgmr.msra.gmra.mrb[6].mxu1 %vm212_vm3, %v752_v13 }
 0xfdf   :  { %2928 = vmatpush3.bf16.msra.mxu1 %v3198_v8  ;;  %2731 = vmatprep.mubr.msk.f32.mxu1 %vm3104_vm1, %v3105_v4 }
 0xfe0   :  { %2929 = vmatprep.subr.bf16.mxu1 %v3103_v0 }
 0xfe3   :  { %2931 = vmatpush3.bf16.msra.mxu1 %v3211_v12 }
 0xfe4   :  { %2940 = vmatprep.subr.bf16.mxu1 %v3103_v0 }
 0xfe5   :  { %v1087_v47 = vld [vmem:[#allocation3 + $0x20] sm:$0xff] }
0x10b1   :  { %v826_v19 = vpop.f32.mrb[6].mxu1 }
0x10b2   :  { %v827_v20 = vadd.f32 %v3239_v18, %v826_v19  ;;  %v2711_v21 = vpop.f32.mrb[7].mxu1 }
0x10b3   :  { %v1240_v21 = vld [vmem:[%s3686_s6 + $0x8] sm:$0xff] }
0x10b4   :  { %838 = vrot.lane.b32.xlu1 %v827_v20, %s3106_s3  ;;  %v830_v23 = vadd.f32 %v827_v20, %v757_v22  ;;  %v1239_v20 = vld [vmem:[%s3686_s6] sm:$0xff] }
0x10b6   :  { %v2457_v24 = vmul.f32 -1.442695, %v830_v23  ;;  %v1241_v23 = vld [vmem:[%s3686_s6 + $0x10] sm:$0xff] }
0x10b8   :  { %3037 = vpow2.f32 %v2457_v24  ;;  %v1242_v24 = vld [vmem:[%s3686_s6 + $0x18] sm:$0xff] }
0x10c2   :  { %v3038_v8 = vpop.eup %3037 }
0x10c3   :  { %v834_v25 = vadd.f32 1.0, %v3038_v8  ;;  %v3419_v8 = vpack.c.bf16 %v1242_v24, %v1241_v23 }
0x10c5   :  { %3039 = vrcp.f32 %v834_v25 }
0x10cf   :  { %v3040_v26 = vpop.eup %3039 }
0x1126   :  { %v839_v27 = vpop.permute.xlu1 %838 }
0x1127   :  { %v841_v28 = vmul.f32 %v3040_v26, %v839_v27 }
0x1129   :  { %843 = vrot.lane.b32.xlu0 %v841_v28, %s3106_s3 }
0x119b   :  { %v844_v12 = vpop.permute.xlu0 %843 }
0x119c   :  { %v846_v29 = vadd.f32 %v844_v12, %v757_v22  ;;  %v3409_v22 = vpack.c.bf16 %v1240_v21, %v1239_v20 }
0x119e   :  { %3041 = vtanh.f32 %v846_v29 }
0x11a8   :  { %v3042_v30 = vpop.eup %3041 }
0x11a9   :  { %v848_v31 = vsub.f32 %v749_v17, %v3042_v30 }
0x11ab   :  { %850 = vrot.lane.b32.xlu1 %v848_v31, %s3107_s4 }
0x121d   :  { %v851_v35 = vpop.permute.xlu1 %850 }
0x121e   :  { %v853_v36 = vmul.f32 %v3040_v26, %v851_v35 }
0x1220   :  { %855 = vrot.lane.b32.xlu0 %v853_v36, %s3108_s26 }
0x1292   :  { %v856_v37 = vpop.permute.xlu0 %855 }
0x1293   :  { %v3361_v38 = vadd.f32 %v3042_v30, %v856_v37  ;;  %v3446_v30 = vld [vmem:[%s3687_s8] ss:$0 sm:$0xff] }
0x1295   :  { %860 = vrot.lane.b32.xlu1 %v3361_v38, %s3106_s3 }
0x1307   :  { %v861_v42 = vpop.permute.xlu1 %860 }
0x1308   :  { %864 = vst.msk [vmem:[#allocation3 + $0x28] sm:$0xff] %vm212_vm3, %v861_v42  ;;  %2721 = vmatmul.mubr.msk.f32.vlgmr.msra.gmra.mrb[12].mxu0 %vm212_vm3, %v861_v42 }
0x1309   :  { %2935 = vmatpush3.bf16.msra.mxu0 %v2932_v34  ;;  %2742 = vmatprep.mubr.msk.f32.mxu0 %vm212_vm3, %v1083_v43 }
0x130a   :  { %2937 = vmatprep.subr.bf16.mxu0 %v2936_v41 }
0x130d   :  { %2939 = vmatpush3.bf16.msra.mxu0 %v2936_v41 }
0x130e   :  { %2952 = vmatprep.subr.bf16.mxu0 %v3103_v0 }
0x130f   :  { %v1088_v48 = vld [vmem:[#allocation3 + $0x28] sm:$0xff] }
0x1310   :  { %2743 = vmatmul.mubr.msk.f32.vlgmr.msra.gmra.mrb[14].mxu0 %vm212_vm3, %v1084_v44 }
0x1311   :  { %2745 = vmatprep.mubr.msk.f32.mxu0 %vm212_vm3, %v1085_v45  ;;  %2954 = vmatpush3.bf16.msra.mxu0 %v3409_v22 }
0x1312   :  { %2955 = vmatprep.subr.bf16.mxu0 %v3103_v0 }
0x1314   :  { %2746 = vmatmul.mubr.msk.f32.gmra.mrb[16].mxu0 %vm212_vm3, %v1086_v46 }
0x1315   :  { %2748 = vmatprep.mubr.msk.f32.mxu0 %vm212_vm3, %v1087_v47  ;;  %2957 = vmatpush3.bf16.msra.mxu0 %v3419_v8 }
0x1316   :  { %2964 = vmatprep.subr.bf16.mxu0 %v3103_v0 }
0x1318   :  { %2749 = vmatmul.mubr.msk.f32.gmra.mrb[18].mxu0 %vm212_vm3, %v1088_v48 }
0x13db   :  { %v935_v49 = vpop.f32.mrb[12].mxu0 }
0x13dc   :  { %v936_v50 = vadd.f32 %v3239_v18, %v935_v49  ;;  %v2722_v51 = vpop.f32.mrb[13].mxu0  ;;  %v975_v49 = vld [vmem:[#allocation2 + $0x38] sm:$0xff] }
0x13de   :  { %947 = vrot.lane.b32.xlu0 %v936_v50, %s3106_s3  ;;  %v939_v3 = vadd.f32 %v936_v50, %v866_v2 }
0x13e0   :  { %v2459_v5 = vmul.f32 -1.442695, %v939_v3 }
0x13e2   :  { %3043 = vpow2.f32 %v2459_v5 }
0x13e3   :  { %v2744_v53 = vpop.f32.mrb[14].mxu0 }
0x13e4   :  { %v1198_v54 = vadd.f32 %v2744_v53, %v3385_v52  ;;  %v1192_v55 = vpop.f32.mrb[15].mxu0 }
0x13e5   :  { %v1193_v56 = vadd.f32 %v3385_v52, %v1192_v55 }
0x13e6   :  { %1232 = vst.msk [vmem:[#allocation2 + $0x8] sm:$0xff] %vm191_vm2, %v1198_v54 }
0x13e7   :  { %1231 = vst.msk [vmem:[#allocation2] sm:$0xff] %vm191_vm2, %v1193_v56  ;;  %v2747_v57 = vpop.f32.mrb[16].mxu0 }
0x13e8   :  { %v1208_v58 = vadd.f32 %v2747_v57, %v3385_v52  ;;  %v1202_v59 = vpop.f32.mrb[17].mxu0 }
0x13e9   :  { %v1203_v60 = vadd.f32 %v3385_v52, %v1202_v59 }
0x13ea   :  { %1234 = vst.msk [vmem:[#allocation2 + $0x18] sm:$0xff] %vm191_vm2, %v1208_v58 }
0x13eb   :  { %1233 = vst.msk [vmem:[#allocation2 + $0x10] sm:$0xff] %vm191_vm2, %v1203_v60  ;;  %v2750_v61 = vpop.f32.mrb[18].mxu0 }
0x13ec   :  { %v1218_v62 = vadd.f32 %v2750_v61, %v3385_v52  ;;  %v1212_v63 = vpop.f32.mrb[19].mxu0  ;;  %v3044_v6 = vpop.eup %3043 }
0x13ed   :  { %v1213_v1 = vadd.f32 %v3385_v52, %v1212_v63  ;;  %v943_v7 = vadd.f32 1.0, %v3044_v6 }
0x13ee   :  { %1236 = vst.msk [vmem:[#allocation2 + $0x28] sm:$0xff] %vm191_vm2, %v1218_v62  ;;  %v1244_v34 = vld [vmem:[#allocation2] sm:$0xff] }
0x13ef   :  { %1235 = vst.msk [vmem:[#allocation2 + $0x20] sm:$0xff] %vm191_vm2, %v1213_v1  ;;  %3045 = vrcp.f32 %v943_v7 }
0x13f9   :  { %v3046_v9 = vpop.eup %3045 }
0x1450   :  { %v948_v10 = vpop.permute.xlu0 %947 }
0x1451   :  { %v950_v11 = vmul.f32 %v3046_v9, %v948_v10  ;;  %v1355_v10 = vld [vmem:[#allocation2 + $0x8] sm:$0xff] }
0x1453   :  { %952 = vrot.lane.b32.xlu1 %v950_v11, %s3106_s3 }
0x14c5   :  { %v953_v14 = vpop.permute.xlu1 %952 }
0x14c6   :  { %v955_v15 = vadd.f32 %v953_v14, %v866_v2 }
0x14c8   :  { %3047 = vtanh.f32 %v955_v15 }
0x14d2   :  { %v3048_v16 = vpop.eup %3047 }
0x14d3   :  { %v957_v17 = vsub.f32 %v3361_v38, %v3048_v16 }
0x14d5   :  { %959 = vrot.lane.b32.xlu0 %v957_v17, %s3107_s4 }
0x1547   :  { %v960_v13 = vpop.permute.xlu0 %959 }
0x1548   :  { %v962_v19 = vmul.f32 %v3046_v9, %v960_v13 }
0x154a   :  { %964 = vrot.lane.b32.xlu1 %v962_v19, %s3108_s26 }
0x15bc   :  { %v965_v25 = vpop.permute.xlu1 %964 }
0x15bd   :  { %v3423_v26 = vadd.f32 %v3048_v16, %v965_v25 }
0x15bf   :  { %969 = vrot.lane.b32.xlu0 %v3423_v26, %s3106_s3 }
0x1631   :  { %v970_v27 = vpop.permute.xlu0 %969 }
0x1632   :  { %973 = vst.msk [vmem:[#allocation3 + $0x30] sm:$0xff] %vm212_vm3, %v970_v27  ;;  %2732 = vmatmul.mubr.msk.f32.vlgmr.msra.gmra.mrb[8].mxu1 %vm212_vm3, %v970_v27 }
0x1633   :  { %2942 = vmatpush3.bf16.msra.mxu1 %v3409_v22  ;;  %2762 = vmatprep.mubr.msk.f32.mxu1 %vm3104_vm1, %v3105_v4 }
0x1634   :  { %2943 = vmatprep.subr.bf16.mxu1 %v3103_v0 }
0x1637   :  { %2945 = vmatpush3.bf16.msra.mxu1 %v3419_v8 }
0x1638   :  { %2946 = vmatprep.subr.bf16.mxu1 %v3103_v0 }
0x1639   :  { %v1089_v28 = vld [vmem:[#allocation3 + $0x30] sm:$0xff] }
0x163a   :  { %2763 = vmatmul.mubr.f32.vlgmr.msra.gmra.mrb[10].mxu1 %v3105_v4  ;;  %2751 = vmatprep.mubr.msk.f32.mxu0 %vm212_vm3, %v1089_v28 }
0x163b   :  { %2948 = vmatpush3.bf16.msra.mxu1 %v3409_v22  ;;  %2773 = vmatprep.mubr.msk.f32.mxu1 %vm3104_vm1, %v3105_v4 }
0x163c   :  { %2949 = vmatprep.subr.bf16.mxu1 %v3103_v0 }
0x163f   :  { %2951 = vmatpush3.bf16.msra.mxu1 %v3419_v8 }
0x1640   :  { %2958 = vmatprep.subr.bf16.mxu1 %v3103_v0 }
0x1705   :  { %v1044_v12 = vpop.f32.mrb[8].mxu1 }
0x1706   :  { %v2733_v29 = vpop.f32.mrb[9].mxu1  ;;  %v1045_v48 = vadd.f32 %v3239_v18, %v1044_v12 }
0x1708   :  { %v1048_v50 = vadd.f32 %v1045_v48, %v975_v49 }
0x170a   :  { %v2461_v51 = vmul.f32 -1.442695, %v1048_v50 }
0x170d   :  { %v1317_v31 = vpop.f32.mrb[10].mxu1 }
0x170e   :  { %v1318_v32 = vadd.f32 %v3446_v30, %v1317_v31  ;;  %v2764_v33 = vpop.f32.mrb[11].mxu1 }
0x1710   :  { %1329 = vrot.lane.b32.xlu1 %v1318_v32, %s3106_s3  ;;  %v1321_v35 = vadd.f32 %v1318_v32, %v1244_v34 }
0x1712   :  { %v2472_v36 = vmul.f32 -1.442695, %v1321_v35 }
0x1714   :  { %3049 = vpow2.f32 %v2472_v36 }
0x171e   :  { %v3050_v37 = vpop.eup %3049 }
0x171f   :  { %v1325_v38 = vadd.f32 1.0, %v3050_v37 }
0x1721   :  { %3051 = vrcp.f32 %v1325_v38  ;;  %v1462_v38 = vld [vmem:[#allocation2 + $0x10] sm:$0xff] }
0x172b   :  { %v3052_v39 = vpop.eup %3051 }
0x1782   :  { %v1330_v40 = vpop.permute.xlu1 %1329 }
0x1783   :  { %v1332_v41 = vmul.f32 %v3052_v39, %v1330_v40 }
0x1785   :  { %1334 = vrot.lane.b32.xlu0 %v1332_v41, %s3106_s3 }
0x17f7   :  { %v1335_v42 = vpop.permute.xlu0 %1334 }
0x17f8   :  { %v1337_v43 = vadd.f32 %v1335_v42, %v1244_v34 }
0x17fa   :  { %3053 = vtanh.f32 %v1337_v43 }
0x17fb   :  { %3055 = vpow2.f32 %v2461_v51 }
0x1804   :  { %v3054_v44 = vpop.eup %3053 }
0x1805   :  { %v1339_v45 = vsub.f32 0.0, %v3054_v44  ;;  %v3056_v53 = vpop.eup %3055 }
0x1806   :  { %v1052_v54 = vadd.f32 1.0, %v3056_v53 }
0x1807   :  { %1341 = vrot.lane.b32.xlu1 %v1339_v45, %s3107_s4 }
0x1808   :  { %3057 = vrcp.f32 %v1052_v54 }
0x1812   :  { %v3058_v57 = vpop.eup %3057 }
0x1879   :  { %v1342_v46 = vpop.permute.xlu1 %1341 }
0x187a   :  { %v1344_v47 = vmul.f32 %v3052_v39, %v1342_v46 }
0x187c   :  { %1346 = vrot.lane.b32.xlu0 %v1344_v47, %s3108_s26 }
0x1880   :  { %1056 = vrot.lane.b32.xlu0 %v1045_v48, %s3106_s3 }
0x18ee   :  { %v1347_v55 = vpop.permute.xlu0 %1346 }
0x18ef   :  { %v1349_v56 = vadd.f32 %v3054_v44, %v1347_v55 }
0x18f1   :  { %1351 = vrot.lane.b32.xlu1 %v1349_v56, %s3106_s3 }
0x18f2   :  { %v1057_v58 = vpop.permute.xlu0 %1056 }
0x18f3   :  { %v1059_v59 = vmul.f32 %v3058_v57, %v1057_v58 }
0x18f5   :  { %1061 = vrot.lane.b32.xlu0 %v1059_v59, %s3106_s3  ;;  %v1569_v59 = vld [vmem:[#allocation2 + $0x18] sm:$0xff] }
0x1963   :  { %v1352_v60 = vpop.permute.xlu1 %1351 }
0x1964   :  { %1354 = vst.msk [vmem:[#allocation3] sm:$0xff] %vm212_vm3, %v1352_v60  ;;  %2774 = vmatmul.mubr.msk.f32.vlgmr.msra.gmra.mrb[12].mxu1 %vm212_vm3, %v1352_v60 }
0x1965   :  { %2960 = vmatpush3.bf16.msra.mxu1 %v3409_v22  ;;  %2795 = vmatprep.mubr.msk.f32.mxu1 %vm3104_vm1, %v3105_v4 }
0x1966   :  { %2961 = vmatprep.subr.bf16.mxu1 %v3103_v0 }
0x1967   :  { %v1062_v18 = vpop.permute.xlu0 %1061 }
0x1968   :  { %v1064_v61 = vadd.f32 %v1062_v18, %v975_v49 }
0x1969   :  { %2963 = vmatpush3.bf16.msra.mxu1 %v3419_v8 }
0x196a   :  { %3059 = vtanh.f32 %v1064_v61  ;;  %2970 = vmatprep.subr.bf16.mxu1 %v3103_v0 }
0x1974   :  { %v3060_v62 = vpop.eup %3059 }
0x1975   :  { %v1066_v63 = vsub.f32 %v3423_v26, %v3060_v62 }
0x1977   :  { %1068 = vrot.lane.b32.xlu0 %v1066_v63, %s3107_s4 }
0x19e9   :  { %v1069_v1 = vpop.permute.xlu0 %1068 }
0x19ea   :  { %v1071_v2 = vmul.f32 %v3058_v57, %v1069_v1 }
0x19ec   :  { %1073 = vrot.lane.b32.xlu0 %v1071_v2, %s3108_s26 }
0x1a37   :  { %v1424_v3 = vpop.f32.mrb[12].mxu1 }
0x1a38   :  { %v1425_v5 = vadd.f32 %v3446_v30, %v1424_v3  ;;  %v2775_v6 = vpop.f32.mrb[13].mxu1 }
0x1a3a   :  { %1436 = vrot.lane.b32.xlu1 %v1425_v5, %s3106_s3  ;;  %v1428_v11 = vadd.f32 %v1425_v5, %v1355_v10 }
0x1a3c   :  { %v2474_v14 = vmul.f32 -1.442695, %v1428_v11 }
0x1a3e   :  { %3061 = vpow2.f32 %v2474_v14 }
0x1a48   :  { %v3062_v15 = vpop.eup %3061 }
0x1a49   :  { %v1432_v16 = vadd.f32 1.0, %v3062_v15 }
0x1a4b   :  { %3063 = vrcp.f32 %v1432_v16 }
0x1a55   :  { %v3064_v17 = vpop.eup %3063 }
0x1a5e   :  { %v1074_v7 = vpop.permute.xlu0 %1073 }
0x1a5f   :  { %v1076_v9 = vadd.f32 %v3060_v62, %v1074_v7 }
0x1a61   :  { %1078 = vrot.lane.b32.xlu0 %v1076_v9, %s3106_s3 }
0x1aac   :  { %v1437_v13 = vpop.permute.xlu1 %1436 }
0x1aad   :  { %v1439_v19 = vmul.f32 %v3064_v17, %v1437_v13 }
0x1aaf   :  { %1441 = vrot.lane.b32.xlu1 %v1439_v19, %s3106_s3  ;;  %v1676_v19 = vld [vmem:[#allocation2 + $0x20] sm:$0xff] }
0x1ad3   :  { %v1079_v20 = vpop.permute.xlu0 %1078 }
0x1ad4   :  { %1082 = vst.msk [vmem:[#allocation3 + $0x38] sm:$0xff] %vm212_vm3, %v1079_v20 }
0x1adb   :  { %v1090_v21 = vld [vmem:[#allocation3 + $0x38] sm:$0xff] }
0x1adc   :  { %2752 = vmatmul.mubr.msk.f32.gmra.mrb[20].mxu0 %vm212_vm3, %v1090_v21 }
0x1add   :  { %2784 = vmatprep.mubr.msk.f32.mxu0 %vm3104_vm1, %v3105_v4 }
0x1b21   :  { %v1442_v23 = vpop.permute.xlu1 %1441 }
0x1b22   :  { %v1444_v24 = vadd.f32 %v1442_v23, %v1355_v10 }
0x1b24   :  { %3065 = vtanh.f32 %v1444_v24 }
0x1b2e   :  { %v3066_v25 = vpop.eup %3065 }
0x1b2f   :  { %v1446_v26 = vsub.f32 %v1349_v56, %v3066_v25 }
0x1b31   :  { %1448 = vrot.lane.b32.xlu1 %v1446_v26, %s3107_s4 }
0x1ba3   :  { %v1449_v27 = vpop.permute.xlu1 %1448 }
0x1ba4   :  { %v1451_v28 = vmul.f32 %v3064_v17, %v1449_v27 }
0x1ba6   :  { %1453 = vrot.lane.b32.xlu1 %v1451_v28, %s3108_s26 }
0x1baf   :  { %v2753_v12 = vpop.f32.mrb[20].mxu0 }
0x1bb0   :  { %v1228_v29 = vadd.f32 %v2753_v12, %v3385_v52  ;;  %v1222_v31 = vpop.f32.mrb[21].mxu0 }
0x1bb1   :  { %v1223_v32 = vadd.f32 %v3385_v52, %v1222_v31 }
0x1bb2   :  { %1238 = vst.msk [vmem:[#allocation2 + $0x38] sm:$0xff] %vm191_vm2, %v1228_v29 }
0x1bb3   :  { %1237 = vst.msk [vmem:[#allocation2 + $0x30] sm:$0xff] %vm191_vm2, %v1223_v32 }
0x1c18   :  { %v1454_v33 = vpop.permute.xlu1 %1453 }
0x1c19   :  { %v1456_v34 = vadd.f32 %v3066_v25, %v1454_v33 }
0x1c1b   :  { %1458 = vrot.lane.b32.xlu1 %v1456_v34, %s3106_s3 }
0x1c8d   :  { %v1459_v35 = vpop.permute.xlu1 %1458 }
0x1c8e   :  { %1461 = vst.msk [vmem:[#allocation3 + $0x8] sm:$0xff] %vm212_vm3, %v1459_v35  ;;  %2785 = vmatmul.mubr.msk.f32.vlgmr.msra.gmra.mrb[22].mxu0 %vm212_vm3, %v1459_v35 }
0x1c8f   :  { %2966 = vmatpush3.bf16.msra.mxu0 %v3409_v22  ;;  %2806 = vmatprep.mubr.msk.f32.mxu0 %vm3104_vm1, %v3105_v4 }
0x1c90   :  { %2967 = vmatprep.subr.bf16.mxu0 %v3103_v0 }
0x1c93   :  { %2969 = vmatpush3.bf16.msra.mxu0 %v3419_v8 }
0x1c94   :  { %2976 = vmatprep.subr.bf16.mxu0 %v3103_v0 }
0x1d61   :  { %v1531_v52 = vpop.f32.mrb[22].mxu0 }
0x1d62   :  { %v1532_v36 = vadd.f32 %v3446_v30, %v1531_v52  ;;  %v2786_v37 = vpop.f32.mrb[23].mxu0 }
0x1d64   :  { %1543 = vrot.lane.b32.xlu0 %v1532_v36, %s3106_s3  ;;  %v1535_v39 = vadd.f32 %v1532_v36, %v1462_v38 }
0x1d66   :  { %v2476_v40 = vmul.f32 -1.442695, %v1535_v39  ;;  %v1783_v39 = vld [vmem:[#allocation2 + $0x28] sm:$0xff] }
0x1d68   :  { %3067 = vpow2.f32 %v2476_v40 }
0x1d72   :  { %v3068_v41 = vpop.eup %3067 }
0x1d73   :  { %v1539_v42 = vadd.f32 1.0, %v3068_v41 }
0x1d75   :  { %3069 = vrcp.f32 %v1539_v42 }
0x1d7f   :  { %v3070_v43 = vpop.eup %3069 }
0x1dd6   :  { %v1544_v44 = vpop.permute.xlu0 %1543 }
0x1dd7   :  { %v1546_v45 = vmul.f32 %v3070_v43, %v1544_v44 }
0x1dd9   :  { %1548 = vrot.lane.b32.xlu1 %v1546_v45, %s3106_s3 }
0x1e4b   :  { %v1549_v46 = vpop.permute.xlu1 %1548 }
0x1e4c   :  { %v1551_v47 = vadd.f32 %v1549_v46, %v1462_v38 }
0x1e4e   :  { %3071 = vtanh.f32 %v1551_v47  ;;  %v2112_v47 = vld [vmem:[%s3688_s9] sm:$0xff] }
0x1e58   :  { %v3072_v48 = vpop.eup %3071 }
0x1e59   :  { %v1553_v49 = vsub.f32 %v1456_v34, %v3072_v48 }
0x1e5b   :  { %1555 = vrot.lane.b32.xlu0 %v1553_v49, %s3107_s4 }
0x1ecd   :  { %v1556_v50 = vpop.permute.xlu0 %1555 }
0x1ece   :  { %v1558_v51 = vmul.f32 %v3070_v43, %v1556_v50 }
0x1ed0   :  { %1560 = vrot.lane.b32.xlu1 %v1558_v51, %s3108_s26 }
0x1f42   :  { %v1561_v53 = vpop.permute.xlu1 %1560 }
0x1f43   :  { %v1563_v54 = vadd.f32 %v3072_v48, %v1561_v53  ;;  %v2113_v48 = vld [vmem:[%s3688_s9 + $0x8] sm:$0xff] }
0x1f44   :  { %v2988_v49 = vpack.c.bf16 %v2113_v48, %v2112_v47  ;;  %v1997_v48 = vld [vmem:[#allocation2 + $0x38] sm:$0xff] }
0x1f45   :  { %1565 = vrot.lane.b32.xlu0 %v1563_v54, %s3106_s3 }
0x1fb7   :  { %v1566_v55 = vpop.permute.xlu0 %1565 }
0x1fb8   :  { %1568 = vst.msk [vmem:[#allocation3 + $0x10] sm:$0xff] %vm212_vm3, %v1566_v55  ;;  %2796 = vmatmul.mubr.msk.f32.vlgmr.msra.gmra.mrb[14].mxu1 %vm212_vm3, %v1566_v55  ;;  %v2114_v55 = vld [vmem:[%s3688_s9 + $0x10] sm:$0xff] }
0x1fb9   :  { %2972 = vmatpush3.bf16.msra.mxu1 %v3409_v22  ;;  %2817 = vmatprep.mubr.msk.f32.mxu1 %vm3104_vm1, %v3105_v4 }
0x1fba   :  { %2973 = vmatprep.subr.bf16.mxu1 %v3103_v0 }
0x1fbd   :  { %2975 = vmatpush3.bf16.msra.mxu1 %v3419_v8 }
0x1fbe   :  { %2982 = vmatprep.subr.bf16.mxu1 %v3103_v0 }
0x208b   :  { %v1638_v56 = vpop.f32.mrb[14].mxu1 }
0x208c   :  { %v1639_v57 = vadd.f32 %v3446_v30, %v1638_v56  ;;  %v2797_v58 = vpop.f32.mrb[15].mxu1  ;;  %v2115_v56 = vld [vmem:[%s3688_s9 + $0x18] sm:$0xff] }
0x208e   :  { %1650 = vrot.lane.b32.xlu1 %v1639_v57, %s3106_s3  ;;  %v1642_v60 = vadd.f32 %v1639_v57, %v1569_v59  ;;  %v2992_v57 = vpack.c.bf16 %v2115_v56, %v2114_v55 }
0x2090   :  { %v2478_v18 = vmul.f32 -1.442695, %v1642_v60  ;;  %v3555_v60 = vld [vmem:[#allocation3 + $0x8] sm:$0xff] }
0x2092   :  { %3073 = vpow2.f32 %v2478_v18  ;;  %v3559_v18 = vld [vmem:[#allocation3 + $0x10] sm:$0xff] }
0x209c   :  { %v3074_v61 = vpop.eup %3073 }
0x209d   :  { %v1646_v62 = vadd.f32 1.0, %v3074_v61 }
0x209f   :  { %3075 = vrcp.f32 %v1646_v62 }
0x20a9   :  { %v3076_v63 = vpop.eup %3075 }
0x2100   :  { %v1651_v1 = vpop.permute.xlu1 %1650 }
0x2101   :  { %v1653_v2 = vmul.f32 %v3076_v63, %v1651_v1 }
0x2103   :  { %1655 = vrot.lane.b32.xlu0 %v1653_v2, %s3106_s3 }
0x2175   :  { %v1656_v3 = vpop.permute.xlu0 %1655 }
0x2176   :  { %v1658_v5 = vadd.f32 %v1656_v3, %v1569_v59  ;;  %v3551_v59 = vld [vmem:[#allocation3] sm:$0xff] }
0x2178   :  { %3077 = vtanh.f32 %v1658_v5 }
0x2182   :  { %v3078_v6 = vpop.eup %3077 }
0x2183   :  { %v1660_v7 = vsub.f32 %v1563_v54, %v3078_v6 }
0x2185   :  { %1662 = vrot.lane.b32.xlu1 %v1660_v7, %s3107_s4 }
0x21f7   :  { %v1663_v9 = vpop.permute.xlu1 %1662 }
0x21f8   :  { %v1665_v10 = vmul.f32 %v3076_v63, %v1663_v9 }
0x21fa   :  { %1667 = vrot.lane.b32.xlu0 %v1665_v10, %s3108_s26 }
0x226c   :  { %v1668_v11 = vpop.permute.xlu0 %1667 }
0x226d   :  { %v1670_v14 = vadd.f32 %v3078_v6, %v1668_v11 }
0x226f   :  { %1672 = vrot.lane.b32.xlu1 %v1670_v14, %s3106_s3 }
0x22e1   :  { %v1673_v15 = vpop.permute.xlu1 %1672 }
0x22e2   :  { %1675 = vst.msk [vmem:[#allocation3 + $0x18] sm:$0xff] %vm212_vm3, %v1673_v15  ;;  %2807 = vmatmul.mubr.msk.f32.vlgmr.msra.gmra.mrb[24].mxu0 %vm212_vm3, %v1673_v15 }
0x22e3   :  { %2978 = vmatpush3.bf16.msra.mxu0 %v3409_v22  ;;  %2828 = vmatprep.mubr.msk.f32.mxu0 %vm3104_vm1, %v3105_v4 }
0x22e4   :  { %2979 = vmatprep.subr.bf16.mxu0 %v3103_v0 }
0x22e7   :  { %2981 = vmatpush3.bf16.msra.mxu0 %v3419_v8 }
0x22e8   :  { %2989 = vmatprep.subr.bf16.mxu0 %v2988_v49 }
0x22e9   :  { %v3563_v61 = vld [vmem:[#allocation3 + $0x18] sm:$0xff] }
0x23b5   :  { %v1745_v16 = vpop.f32.mrb[24].mxu0 }
0x23b6   :  { %v1746_v17 = vadd.f32 %v3446_v30, %v1745_v16  ;;  %v2808_v13 = vpop.f32.mrb[25].mxu0 }
0x23b8   :  { %1757 = vrot.lane.b32.xlu0 %v1746_v17, %s3106_s3  ;;  %v1749_v20 = vadd.f32 %v1746_v17, %v1676_v19 }
0x23ba   :  { %v2480_v21 = vmul.f32 -1.442695, %v1749_v20 }
0x23bc   :  { %3079 = vpow2.f32 %v2480_v21 }
0x23c6   :  { %v3080_v23 = vpop.eup %3079 }
0x23c7   :  { %v1753_v24 = vadd.f32 1.0, %v3080_v23 }
0x23c9   :  { %3081 = vrcp.f32 %v1753_v24 }
0x23d3   :  { %v3082_v25 = vpop.eup %3081 }
0x242a   :  { %v1758_v26 = vpop.permute.xlu0 %1757 }
0x242b   :  { %v1760_v27 = vmul.f32 %v3082_v25, %v1758_v26 }
0x242d   :  { %1762 = vrot.lane.b32.xlu1 %v1760_v27, %s3106_s3  ;;  %v2252_v27 = vld [vmem:[%s3689_s11] sm:$0xff] }
0x249f   :  { %v1763_v28 = vpop.permute.xlu1 %1762 }
0x24a0   :  { %v1765_v12 = vadd.f32 %v1763_v28, %v1676_v19  ;;  %v2253_v28 = vld [vmem:[%s3689_s11 + $0x8] sm:$0xff] }
0x24a2   :  { %3083 = vtanh.f32 %v1765_v12  ;;  %v2996_v12 = vpack.c.bf16 %v2253_v28, %v2252_v27 }
0x24ac   :  { %v3084_v29 = vpop.eup %3083 }
0x24ad   :  { %v1767_v31 = vsub.f32 %v1670_v14, %v3084_v29  ;;  %v1890_v14 = vld [vmem:[#allocation2 + $0x30] sm:$0xff] }
0x24af   :  { %1769 = vrot.lane.b32.xlu0 %v1767_v31, %s3107_s4 }
0x2521   :  { %v1770_v32 = vpop.permute.xlu0 %1769 }
0x2522   :  { %v1772_v33 = vmul.f32 %v3082_v25, %v1770_v32 }
0x2524   :  { %1774 = vrot.lane.b32.xlu1 %v1772_v33, %s3108_s26 }
0x2596   :  { %v1775_v34 = vpop.permute.xlu1 %1774 }
0x2597   :  { %v1777_v35 = vadd.f32 %v3084_v29, %v1775_v34  ;;  %v3590_v34 = vld [vmem:[%s3690_s10] ss:$0 sm:$0xff]  ;;  %s3109_s10 = smov 24  }
0x2599   :  { %1779 = vrot.lane.b32.xlu0 %v1777_v35, %s3106_s3 }
0x260b   :  { %v1780_v52 = vpop.permute.xlu0 %1779 }
0x260c   :  { %1782 = vst.msk [vmem:[#allocation3 + $0x20] sm:$0xff] %vm212_vm3, %v1780_v52  ;;  %2818 = vmatmul.mubr.msk.f32.vlgmr.msra.gmra.mrb[16].mxu1 %vm212_vm3, %v1780_v52 }
0x260d   :  { %2984 = vmatpush3.bf16.msra.mxu1 %v3409_v22  ;;  %2839 = vmatprep.mubr.msk.f32.mxu1 %vm3104_vm1, %v3105_v4 }
0x260e   :  { %2985 = vmatprep.subr.bf16.mxu1 %v3103_v0 }
0x2611   :  { %2987 = vmatpush3.bf16.msra.mxu1 %v3419_v8 }
0x2612   :  { %2997 = vmatprep.subr.bf16.mxu1 %v2996_v12 }
0x2613   :  { %v3567_v62 = vld [vmem:[#allocation3 + $0x20] sm:$0xff] }
0x26df   :  { %v1852_v36 = vpop.f32.mrb[16].mxu1 }
0x26e0   :  { %v1853_v37 = vadd.f32 %v3446_v30, %v1852_v36  ;;  %v2819_v38 = vpop.f32.mrb[17].mxu1  ;;  %v2254_v36 = vld [vmem:[%s3689_s11 + $0x10] sm:$0xff] }
0x26e2   :  { %1864 = vrot.lane.b32.xlu1 %v1853_v37, %s3106_s3  ;;  %v1856_v40 = vadd.f32 %v1853_v37, %v1783_v39 }
0x26e4   :  { %v2482_v41 = vmul.f32 -1.442695, %v1856_v40 }
0x26e6   :  { %3085 = vpow2.f32 %v2482_v41 }
0x26f0   :  { %v3086_v42 = vpop.eup %3085 }
0x26f1   :  { %v1860_v43 = vadd.f32 1.0, %v3086_v42 }
0x26f3   :  { %3087 = vrcp.f32 %v1860_v43 }
0x26fd   :  { %v3088_v22 = vpop.eup %3087 }
0x2754   :  { %v1865_v44 = vpop.permute.xlu1 %1864 }
0x2755   :  { %v1867_v4 = vmul.f32 %v3088_v22, %v1865_v44 }
0x2757   :  { %1869 = vrot.lane.b32.xlu0 %v1867_v4, %s3106_s3 }
0x27c9   :  { %v1870_v0 = vpop.permute.xlu0 %1869 }
0x27ca   :  { %v1872_v8 = vadd.f32 %v1870_v0, %v1783_v39 }
0x27cc   :  { %3089 = vtanh.f32 %v1872_v8 }
0x27d6   :  { %v3090_v45 = vpop.eup %3089 }
0x27d7   :  { %v1874_v46 = vsub.f32 %v1777_v35, %v3090_v45 }
0x27d9   :  { %1876 = vrot.lane.b32.xlu1 %v1874_v46, %s3107_s4 }
0x284b   :  { %v1877_v50 = vpop.permute.xlu1 %1876 }
0x284c   :  { %v1879_v51 = vmul.f32 %v3088_v22, %v1877_v50 }
0x284e   :  { %1881 = vrot.lane.b32.xlu0 %v1879_v51, %s3108_s26 }
0x28c0   :  { %v1882_v53 = vpop.permute.xlu0 %1881 }
0x28c1   :  { %v1884_v54 = vadd.f32 %v3090_v45, %v1882_v53 }
0x28c3   :  { %1886 = vrot.lane.b32.xlu1 %v1884_v54, %s3106_s3 }
0x2935   :  { %v1887_v58 = vpop.permute.xlu1 %1886 }
0x2936   :  { %1889 = vst.msk [vmem:[#allocation3 + $0x28] sm:$0xff] %vm212_vm3, %v1887_v58  ;;  %2829 = vmatmul.mubr.msk.f32.vlgmr.msra.gmra.mrb[26].mxu0 %vm212_vm3, %v1887_v58 }
0x2937   :  { %2991 = vmatpush3.bf16.msra.mxu0 %v2988_v49  ;;  %2850 = vmatprep.mubr.msk.f32.mxu0 %vm212_vm3, %v3551_v59 }
0x2938   :  { %2993 = vmatprep.subr.bf16.mxu0 %v2992_v57 }
0x293b   :  { %2995 = vmatpush3.bf16.msra.mxu0 %v2992_v57 }
0x293d   :  { %v3571_v63 = vld [vmem:[#allocation3 + $0x28] sm:$0xff] }
0x293e   :  { %2851 = vmatmul.mubr.msk.f32.vlgmr.msra.gmra.mrb[28].mxu0 %vm212_vm3, %v3555_v60 }
0x293f   :  { %2853 = vmatprep.mubr.msk.f32.mxu0 %vm212_vm3, %v3559_v18 }
0x2942   :  { %2854 = vmatmul.mubr.msk.f32.gmra.mrb[30].mxu0 %vm212_vm3, %v3563_v61 }
0x2943   :  { %2856 = vmatprep.mubr.msk.f32.mxu0 %vm212_vm3, %v3567_v62 }
0x2946   :  { %2857 = vmatmul.mubr.msk.f32.gmra.mrb[32].mxu0 %vm212_vm3, %v3571_v63 }
0x2a09   :  { %v1959_v1 = vpop.f32.mrb[26].mxu0 }
0x2a0a   :  { %v1960_v2 = vadd.f32 %v3446_v30, %v1959_v1  ;;  %v2830_v3 = vpop.f32.mrb[27].mxu0 }
0x2a0c   :  { %1971 = vrot.lane.b32.xlu0 %v1960_v2, %s3106_s3  ;;  %v1963_v15 = vadd.f32 %v1960_v2, %v1890_v14 }
0x2a0e   :  { %v2484_v16 = vmul.f32 -1.442695, %v1963_v15 }
0x2a10   :  { %3091 = vpow2.f32 %v2484_v16 }
0x2a11   :  { %v2852_v5 = vpop.f32.mrb[28].mxu0 }
0x2a12   :  { %v2213_v6 = vpop.f32.mrb[29].mxu0  ;;  %v2219_v37 = vadd.f32 %v2852_v5, %v3590_v34  ;;  %v2496_v5 = vld [vmem:[%s3691_s12] ss:$0 sm:$0xff] }
0x2a13   :  { %v2214_v35 = vadd.f32 %v3590_v34, %v2213_v6 }
0x2a15   :  { %v2855_v7 = vpop.f32.mrb[30].mxu0 }
0x2a16   :  { %v2223_v9 = vpop.f32.mrb[31].mxu0  ;;  %v2229_v40 = vadd.f32 %v2855_v7, %v3590_v34 }
0x2a17   :  { %v2224_v38 = vadd.f32 %v3590_v34, %v2223_v9 }
0x2a19   :  { %v2858_v10 = vpop.f32.mrb[32].mxu0 }
0x2a1a   :  { %v2233_v11 = vpop.f32.mrb[33].mxu0  ;;  %v3092_v17 = vpop.eup %3091  ;;  %v2239_v42 = vadd.f32 %v2858_v10, %v3590_v34 }
0x2a1b   :  { %v1967_v13 = vadd.f32 1.0, %v3092_v17  ;;  %v2234_v41 = vadd.f32 %v3590_v34, %v2233_v11 }
0x2a1d   :  { %3093 = vrcp.f32 %v1967_v13 }
0x2a27   :  { %v3094_v19 = vpop.eup %3093 }
0x2a7e   :  { %v1972_v20 = vpop.permute.xlu0 %1971 }
0x2a7f   :  { %v1974_v21 = vmul.f32 %v3094_v19, %v1972_v20 }
0x2a81   :  { %1976 = vrot.lane.b32.xlu1 %v1974_v21, %s3106_s3 }
0x2af3   :  { %v1977_v23 = vpop.permute.xlu1 %1976 }
0x2af4   :  { %v1979_v24 = vadd.f32 %v1977_v23, %v1890_v14 }
0x2af6   :  { %3095 = vtanh.f32 %v1979_v24 }
0x2b00   :  { %v3096_v25 = vpop.eup %3095 }
0x2b01   :  { %v1981_v26 = vsub.f32 %v1884_v54, %v3096_v25 }
0x2b03   :  { %1983 = vrot.lane.b32.xlu0 %v1981_v26, %s3107_s4 }
0x2b75   :  { %v1984_v29 = vpop.permute.xlu0 %1983 }
0x2b76   :  { %v1986_v31 = vmul.f32 %v3094_v19, %v1984_v29 }
0x2b78   :  { %1988 = vrot.lane.b32.xlu1 %v1986_v31, %s3108_s26 }
0x2bea   :  { %v1989_v32 = vpop.permute.xlu1 %1988 }
0x2beb   :  { %v1991_v33 = vadd.f32 %v3096_v25, %v1989_v32 }
0x2bed   :  { %1993 = vrot.lane.b32.xlu0 %v1991_v33, %s3106_s3 }
0x2c5f   :  { %v1994_v52 = vpop.permute.xlu0 %1993 }
0x2c60   :  { %1996 = vst.msk [vmem:[#allocation3 + $0x30] sm:$0xff] %vm212_vm3, %v1994_v52  ;;  %2840 = vmatmul.mubr.msk.f32.vlgmr.msra.gmra.mrb[18].mxu1 %vm212_vm3, %v1994_v52 }
0x2c61   :  { %2999 = vmatpush3.bf16.msra.mxu1 %v2996_v12  ;;  %2868 = vmatprep.mubr.msk.f32.mxu1 %vm2262_vm4, %v2214_v35 }
0x2c62   :  { %2866 = vmatprep.subr.mxu1 %v2254_v36 }
0x2c65   :  { %2867 = vmatpush3.msra.mxu1 %v2254_v36 }
0x2c66   :  { %2869 = vmatmul.mubr.msk.f32.vlgmr.msra.gmra.mrb[20].mxu1 %vm2262_vm4, %v2219_v37 }
0x2c67   :  { %2871 = vmatprep.mubr.msk.f32.mxu1 %vm2262_vm4, %v2224_v38  ;;  %v2110_v39 = vld [vmem:[#allocation3 + $0x30] sm:$0xff] }
0x2c68   :  { %2859 = vmatprep.mubr.msk.f32.mxu0 %vm212_vm3, %v2110_v39 }
0x2c6a   :  { %2872 = vmatmul.mubr.msk.f32.gmra.mrb[22].mxu1 %vm2262_vm4, %v2229_v40 }
0x2c6b   :  { %2874 = vmatprep.mubr.msk.f32.mxu1 %vm2262_vm4, %v2234_v41 }
0x2c6e   :  { %2875 = vmatmul.mubr.msk.f32.gmra.mrb[24].mxu1 %vm2262_vm4, %v2239_v42 }
0x2d33   :  { %v2066_v43 = vpop.f32.mrb[18].mxu1 }
0x2d34   :  { %v2067_v22 = vadd.f32 %v3446_v30, %v2066_v43  ;;  %v2841_v44 = vpop.f32.mrb[19].mxu1 }
0x2d36   :  { %2078 = vrot.lane.b32.xlu1 %v2067_v22, %s3106_s3  ;;  %v2070_v49 = vadd.f32 %v2067_v22, %v1997_v48 }
0x2d38   :  { %v2486_v50 = vmul.f32 -1.442695, %v2070_v49 }
0x2d39   :  { %v2870_v4 = vpop.f32.mrb[20].mxu1 }
0x2d3a   :  { %v2353_v0 = vpop.f32.mrb[21].mxu1  ;;  %3097 = vpow2.f32 %v2486_v50  ;;  %v2359_v17 = vadd.f32 %v2870_v4, %v2496_v5 }
0x2d3b   :  { %v2354_v9 = vadd.f32 %v2496_v5, %v2353_v0 }
0x2d3d   :  { %v2873_v8 = vpop.f32.mrb[22].mxu1 }
0x2d3e   :  { %v2363_v45 = vpop.f32.mrb[23].mxu1 }
0x2d41   :  { %v2876_v46 = vpop.f32.mrb[24].mxu1 }
0x2d42   :  { %v2373_v47 = vpop.f32.mrb[25].mxu1 }
0x2d43   :  { %v2374_v14 = vadd.f32 %v2496_v5, %v2373_v47 }
0x2d44   :  { %v3098_v51 = vpop.eup %3097 }
0x2d45   :  { %v2074_v53 = vadd.f32 1.0, %v3098_v51 }
0x2d47   :  { %3099 = vrcp.f32 %v2074_v53 }
0x2d51   :  { %v3100_v54 = vpop.eup %3099 }
0x2da8   :  { %v2079_v55 = vpop.permute.xlu1 %2078 }
0x2da9   :  { %v2081_v56 = vmul.f32 %v3100_v54, %v2079_v55 }
0x2dab   :  { %2083 = vrot.lane.b32.xlu0 %v2081_v56, %s3106_s3 }
0x2e1d   :  { %v2084_v30 = vpop.permute.xlu0 %2083 }
0x2e1e   :  { %v2086_v57 = vadd.f32 %v2084_v30, %v1997_v48 }
0x2e20   :  { %3101 = vtanh.f32 %v2086_v57 }
0x2e2a   :  { %v3102_v58 = vpop.eup %3101 }
0x2e2b   :  { %v2088_v1 = vsub.f32 %v1991_v33, %v3102_v58 }
0x2e2d   :  { %2090 = vrot.lane.b32.xlu1 %v2088_v1, %s3107_s4 }
0x2e9f   :  { %v2091_v2 = vpop.permute.xlu1 %2090 }
0x2ea0   :  { %v2093_v3 = vmul.f32 %v3100_v54, %v2091_v2 }
0x2ea2   :  { %2095 = vrot.lane.b32.xlu0 %v2093_v3, %s3108_s26 }
0x2ea6   :  { %2392 = vrot.lane.b32.xlu0 %v3551_v59, %s3109_s10 }
0x2eaa   :  { %2396 = vrot.lane.b32.xlu0 %v3559_v18, %s3109_s10  ;;  %v2364_v18 = vadd.f32 %v2496_v5, %v2363_v45 }
0x2eae   :  { %2400 = vrot.lane.b32.xlu0 %v3567_v62, %s3109_s10 }
0x2eb2   :  { %2404 = vrot.lane.b32.xlu0 %v2110_v39, %s3109_s10 }
0x2f14   :  { %v2096_v6 = vpop.permute.xlu0 %2095 }
0x2f15   :  { %v2098_v7 = vadd.f32 %v3102_v58, %v2096_v6 }
0x2f17   :  { %2100 = vrot.lane.b32.xlu1 %v2098_v7, %s3106_s3 }
0x2f18   :  { %v2393_v10 = vpop.permute.xlu0 %2392 }
0x2f19   :  { %v2416_v59 = vsel %vm2262_vm4, %v2354_v9, %v2393_v10 }
0x2f1a   :  { %2425 = vst.msk [vmem:[%s3692_s13] sm:$0xff] %vm2424_vm5, %v2416_v59 }
0x2f1b   :  { %2394 = vrot.lane.b32.xlu1 %v3555_v60, %s3109_s10 }
0x2f1c   :  { %v2397_v62 = vpop.permute.xlu0 %2396 }
0x2f1d   :  { %v2418_v11 = vsel %vm2262_vm4, %v2364_v18, %v2397_v62 }
0x2f1e   :  { %2427 = vst.msk [vmem:[%s3692_s13 + $0x10] sm:$0xff] %vm2424_vm5, %v2418_v11 }
0x2f1f   :  { %2398 = vrot.lane.b32.xlu1 %v3563_v61, %s3109_s10  ;;  %v2369_v61 = vadd.f32 %v2873_v8, %v2496_v5 }
0x2f20   :  { %v2401_v15 = vpop.permute.xlu0 %2400 }
0x2f21   :  { %v2420_v16 = vsel %vm2262_vm4, %v2374_v14, %v2401_v15 }
0x2f22   :  { %2429 = vst.msk [vmem:[%s3692_s13 + $0x20] sm:$0xff] %vm2424_vm5, %v2420_v16 }
0x2f23   :  { %2402 = vrot.lane.b32.xlu1 %v3571_v63, %s3109_s10  ;;  %v2379_v63 = vadd.f32 %v2876_v46, %v2496_v5 }
0x2f24   :  { %v2405_v52 = vpop.permute.xlu0 %2404 }
0x2f89   :  { %v2101_v60 = vpop.permute.xlu1 %2100 }
0x2f8a   :  { %2103 = vst.msk [vmem:[#allocation3 + $0x38] sm:$0xff] %vm212_vm3, %v2101_v60 }
0x2f8d   :  { %v2395_v13 = vpop.permute.xlu1 %2394 }
0x2f8e   :  { %v2417_v19 = vsel %vm2262_vm4, %v2359_v17, %v2395_v13 }
0x2f8f   :  { %2426 = vst.msk [vmem:[%s3692_s13 + $0x8] sm:$0xff] %vm2424_vm5, %v2417_v19 }
0x2f91   :  { %v2399_v20 = vpop.permute.xlu1 %2398  ;;  %v2111_v21 = vld [vmem:[#allocation3 + $0x38] sm:$0xff] }
0x2f92   :  { %v2419_v23 = vsel %vm2262_vm4, %v2369_v61, %v2399_v20  ;;  %2406 = vrot.lane.b32.xlu1 %v2111_v21, %s3109_s10  ;;  %2860 = vmatmul.mubr.msk.f32.gmra.mrb[34].mxu0 %vm212_vm3, %v2111_v21 }
0x2f93   :  { %2428 = vst.msk [vmem:[%s3692_s13 + $0x18] sm:$0xff] %vm2424_vm5, %v2419_v23 }
0x2f95   :  { %v2403_v24 = vpop.permute.xlu1 %2402 }
0x2f96   :  { %v2421_v25 = vsel %vm2262_vm4, %v2379_v63, %v2403_v24 }
0x2f97   :  { %2430 = vst.msk [vmem:[%s3692_s13 + $0x28] sm:$0xff] %vm2424_vm5, %v2421_v25 }
0x3004   :  { %v2407_v33 = vpop.permute.xlu1 %2406 }
0x3065   :  { %v2861_v26 = vpop.f32.mrb[34].mxu0 }
0x3066   :  { %v2243_v27 = vpop.f32.mrb[35].mxu0  ;;  %v2249_v12 = vadd.f32 %v2861_v26, %v3590_v34 }
0x3067   :  { %v2244_v28 = vadd.f32 %v3590_v34, %v2243_v27 }
0x3069   :  { %2877 = vmatprep.mubr.msk.f32.mxu1 %vm2262_vm4, %v2244_v28 }
0x306a   :  { %2878 = vmatmul.mubr.msk.f32.gmra.mrb[26].mxu1 %vm2262_vm4, %v2249_v12 }
0x313d   :  { %v2879_v29 = vpop.f32.mrb[26].mxu1 }
0x313e   :  { %v2389_v31 = vadd.f32 %v2879_v29, %v2496_v5  ;;  %v2383_v32 = vpop.f32.mrb[27].mxu1 }
0x313f   :  { %v2384_v35 = vadd.f32 %v2496_v5, %v2383_v32 }
0x3140   :  { %v2423_v36 = vsel %vm2262_vm4, %v2389_v31, %v2407_v33 }
0x3141   :  { %2432 = vst.msk [vmem:[%s3692_s13 + $0x38] sm:$0xff] %vm2424_vm5, %v2423_v36  ;;  %v2422_v37 = vsel %vm2262_vm4, %v2384_v35, %v2405_v52 }
0x3142   :  { %2431 = vst.msk [vmem:[%s3692_s13 + $0x30] sm:$0xff] %vm2424_vm5, %v2422_v37 }

</bundles_post_ra>
